<compile_context>
chip_gen: v5e
topology: v5e:2x2
jax: 0.10.0
libtpu: 0.0.40
codegen_flags: <defaults>
</compile_context>

<pallas_src>
import jax
import jax.numpy as jnp
from jax import lax
from jax.experimental import pallas as pl
from jax.experimental.pallas import tpu as pltpu

_NEG = -1e30   # finite "minus infinity" for padded classifier columns
_LANE = 128


def _round_up(n, m):
    return ((n + m - 1) // m) * m


# ----------------------------------------------------------------------------
# Pallas kernels
# ----------------------------------------------------------------------------
def _lstm_recurrence(x_ref, wih_ref, whh_ref, b_ref, h0_ref, c0_ref,
                     h_scr, c_scr, gx_scr, emit_h, *, max_unroll=8):
    """Run the LSTM recurrence over one T-chunk.

    x_ref:   (Tt, B, D)    chunk of the input sequence (streamed via grid)
    wih_ref: (D, 4Hp)      W_ih^T, gate columns pre-ordered [i, f, o, g], bf16/f32
    whh_ref: (Hp, 4Hp)     W_hh^T, same order/dtype
    b_ref:   (1, 4Hp)      b_ih + b_hh (f32), same order
    h0/c0:   (B, Hp)       initial state (consumed only on grid step 0)
    h_scr/c_scr: (B, Hp)   f32 VMEM scratch carrying the recurrence across chunks
    gx_scr:  (Tt, B, 4Hp)  f32 VMEM scratch for the hoisted input projection
    emit_h(t, h) or None   per-step hidden emitter (None for the last layer)
    """
    Tt, B, D = x_ref.shape
    Hp = h0_ref.shape[-1]

    @pl.when(pl.program_id(0) == 0)
    def _():
        h_scr[...] = h0_ref[...]
        c_scr[...] = c0_ref[...]

    # Input-side projection for the whole chunk in ONE MXU pass (parallel over
    # time) — off the serial critical path. bf16 operands, f32 accumulation,
    # bias folded in here.
    gx_scr[...] = (
        jnp.dot(x_ref[...].reshape(Tt * B, D).astype(wih_ref.dtype),
                wih_ref[...], preferred_element_type=jnp.float32)
        + b_ref[...]
    ).reshape(Tt, B, 4 * Hp)

    whh = whh_ref[...]   # hoisted invariant load (no per-step vld / broadcast)

    def step(t, carry):
        h, c = carry     # carried in f32 vregs
        # Single small matmul on the serial path (bf16 operands, f32 accum).
        gates = gx_scr[t] + jnp.dot(h.astype(whh.dtype), whh,
                                    preferred_element_type=jnp.float32)
        # Gate columns pre-ordered [i, f, o, g]; Hp is a multiple of 128 so
        # every slice is whole-vreg aligned (no lane rotates).
        sig = jax.nn.sigmoid(gates[:, :3 * Hp])
        g_g = jnp.tanh(gates[:, 3 * Hp:])
        i_g = sig[:, 0 * Hp:1 * Hp]
        f_g = sig[:, 1 * Hp:2 * Hp]
        o_g = sig[:, 2 * Hp:3 * Hp]
        c_new = f_g * c + i_g * g_g
        h_new = o_g * jnp.tanh(c_new)
        if emit_h is not None:
            emit_h(t, h_new)
        return h_new, c_new

    # Bounded unroll: enough for the LLO scheduler to overlap step t's EUP
    # work with step t+1's MXU push, without blowing live ranges at large H.
    h_fin, c_fin = lax.fori_loop(0, Tt, step, (h_scr[...], c_scr[...]),
                                 unroll=min(Tt, max_unroll))
    h_scr[...] = h_fin
    c_scr[...] = c_fin


def lstm_seq_layer_kernel(x_ref, wih_ref, whh_ref, b_ref, h0_ref, c0_ref,
                          out_ref, h_scr, c_scr, gx_scr):
    """Intermediate LSTM layer: emits the per-timestep hidden sequence."""

    def emit(t, h_new):
        out_ref[t] = h_new.astype(out_ref.dtype)   # bf16 inter-layer output

    _lstm_recurrence(x_ref, wih_ref, whh_ref, b_ref, h0_ref, c0_ref,
                     h_scr, c_scr, gx_scr, emit)


def lstm_last_layer_kernel(x_ref, wih_ref, whh_ref, b_ref, h0_ref, c0_ref,
                           wcls_ref, bcls_ref, out_ref, h_scr, c_scr, gx_scr):
    """Last LSTM layer fused with Linear + log_softmax on the final hidden."""
    _lstm_recurrence(x_ref, wih_ref, whh_ref, b_ref, h0_ref, c0_ref,
                     h_scr, c_scr, gx_scr, emit_h=None)

    @pl.when(pl.program_id(0) == pl.num_programs(0) - 1)
    def _():
        h = h_scr[...]                                        # (B, Hp) f32
        logits = (jnp.dot(h, wcls_ref[...],
                          preferred_element_type=jnp.float32)
                  + bcls_ref[...])                            # (B, Cp) lane-dense
        m = jnp.max(logits, axis=-1, keepdims=True)
        shifted = logits - m
        lse = jnp.log(jnp.sum(jnp.exp(shifted), axis=-1, keepdims=True))
        out_ref[...] = shifted - lse


# ----------------------------------------------------------------------------
# VMEM budgeting / chunk planning
# ----------------------------------------------------------------------------
def _vmem_budget_bytes():
    try:
        return int(pltpu.get_tpu_info().vmem_capacity_bytes) * 3 // 4
    except Exception:
        return 48 << 20   # safe default: fits v5e/v6e (128 MiB) and v7x (64 MiB)


def _largest_divisor_at_most(T, target):
    target = int(max(1, min(T, target)))
    for c in range(target, 0, -1):
        if T % c == 0:
            return c
    return 1


def _plan_chunk(T, per_t_bytes, fixed_bytes, budget, t_cap):
    avail = max(budget - fixed_bytes, per_t_bytes)
    return _largest_divisor_at_most(T, min(t_cap, avail // per_t_bytes))


def _common_specs(Tt, B, D, Hp):
    # Resident inputs have constant index_maps (not re-fetched per chunk).
    # TODO(synk): pipeline_mode=pl.Buffered(1) on these would halve their
    # double-buffered VMEM footprint at large H.
    return [
        pl.BlockSpec((Tt, B, D), lambda t: (t, 0, 0)),     # x: streamed over T
        pl.BlockSpec((D, 4 * Hp), lambda t: (0, 0)),       # W_ih^T: resident
        pl.BlockSpec((Hp, 4 * Hp), lambda t: (0, 0)),      # W_hh^T: resident
        pl.BlockSpec((1, 4 * Hp), lambda t: (0, 0)),       # bias:   resident
        pl.BlockSpec((B, Hp), lambda t: (0, 0)),           # h0
        pl.BlockSpec((B, Hp), lambda t: (0, 0)),           # c0
    ]


# ----------------------------------------------------------------------------
# Wrappers
# ----------------------------------------------------------------------------
def lstm_seq_layer(x, wih_t, whh_t, b, h0, c0, *, out_dtype, t_cap=128):
    T, B, D = x.shape
    Hp = h0.shape[-1]
    budget = _vmem_budget_bytes()
    w_item = jnp.dtype(wih_t.dtype).itemsize
    # Resident (double-buffered by default): weights, bias, h0, c0; plus h/c scratch.
    fixed = 2 * (D * 4 * Hp * w_item + Hp * 4 * Hp * w_item
                 + 4 * Hp * 4 + 2 * B * Hp * 4)
    fixed += 2 * B * Hp * 4 + (2 << 20)           # h/c scratch + compiler slack
    per_t = (2 * B * D * jnp.dtype(x.dtype).itemsize        # x (double-buffered)
             + 2 * B * Hp * jnp.dtype(out_dtype).itemsize   # out (double-buffered)
             + B * 4 * Hp * 4)                               # gx_scr (f32)
    Tt = _plan_chunk(T, per_t, fixed, budget, t_cap)
    return pl.pallas_call(
        lstm_seq_layer_kernel,
        out_shape=jax.ShapeDtypeStruct((T, B, Hp), out_dtype),
        grid=(T // Tt,),
        in_specs=_common_specs(Tt, B, D, Hp),
        out_specs=pl.BlockSpec((Tt, B, Hp), lambda t: (t, 0, 0)),
        scratch_shapes=[pltpu.VMEM((B, Hp), jnp.float32),
                        pltpu.VMEM((B, Hp), jnp.float32),
                        pltpu.VMEM((Tt, B, 4 * Hp), jnp.float32)],
        compiler_params=pltpu.CompilerParams(
            dimension_semantics=("arbitrary",),   # serial recurrence over T
            vmem_limit_bytes=int(budget)),
    )(x, wih_t, whh_t, b, h0, c0)


def lstm_last_layer(x, wih_t, whh_t, b, h0, c0, wcls_t, bcls, *, t_cap=128):
    T, B, D = x.shape
    Hp = h0.shape[-1]
    Cp = wcls_t.shape[-1]
    budget = _vmem_budget_bytes()
    w_item = jnp.dtype(wih_t.dtype).itemsize
    # TODO(synk): if Cp is in the thousands, tile Cp or split the classifier
    # into its own tiny pallas_call instead of keeping wcls resident.
    fixed = 2 * (D * 4 * Hp * w_item + Hp * 4 * Hp * w_item
                 + 4 * Hp * 4 + 2 * B * Hp * 4
                 + Hp * Cp * 4 + Cp * 4 + B * Cp * 4)
    fixed += 2 * B * Hp * 4 + (2 << 20)
    per_t = 2 * B * D * jnp.dtype(x.dtype).itemsize + B * 4 * Hp * 4
    Tt = _plan_chunk(T, per_t, fixed, budget, t_cap)
    return pl.pallas_call(
        lstm_last_layer_kernel,
        out_shape=jax.ShapeDtypeStruct((B, Cp), jnp.float32),
        grid=(T // Tt,),
        in_specs=_common_specs(Tt, B, D, Hp) + [
            pl.BlockSpec((Hp, Cp), lambda t: (0, 0)),      # W_cls^T (padded, f32)
            pl.BlockSpec((1, Cp), lambda t: (0, 0)),       # b_cls  (padded)
        ],
        out_specs=pl.BlockSpec((B, Cp), lambda t: (0, 0)),  # written on last step
        scratch_shapes=[pltpu.VMEM((B, Hp), jnp.float32),
                        pltpu.VMEM((B, Hp), jnp.float32),
                        pltpu.VMEM((Tt, B, 4 * Hp), jnp.float32)],
        compiler_params=pltpu.CompilerParams(
            dimension_semantics=("arbitrary",),
            vmem_limit_bytes=int(budget)),
    )(x, wih_t, whh_t, b, h0, c0, wcls_t, bcls)


# ----------------------------------------------------------------------------
# One-time parameter preparation
# ----------------------------------------------------------------------------
def _reorder_and_pad_gates(w_t, H, Hp):
    """Gate columns [i,f,g,o] (PyTorch) -> [i,f,o,g], each lane-padded to Hp."""
    gates = [w_t[..., 0:H], w_t[..., H:2 * H],
             w_t[..., 3 * H:4 * H], w_t[..., 2 * H:3 * H]]
    if Hp != H:
        pad = [(0, 0)] * (w_t.ndim - 1) + [(0, Hp - H)]
        gates = [jnp.pad(g, pad) for g in gates]
    return jnp.concatenate(gates, axis=-1)


def _pad_axis(a, axis, new_size):
    if a.shape[axis] == new_size:
        return a
    pad = [(0, 0)] * a.ndim
    pad[axis] = (0, new_size - a.shape[axis])
    return jnp.pad(a, pad)


def prepare_params(lstm_params, cls_params, h0, c0, hidden_size, *,
                   compute_dtype=jnp.bfloat16, lane=_LANE):
    """Transpose, gate-reorder, bias-fold, lane-pad (H->Hp, C->Cp), cast."""
    H = hidden_size
    Hp = _round_up(H, lane)
    prepped = []
    for li, (w_ih, w_hh, b_ih, b_hh) in enumerate(lstm_params):
        wih_t = _reorder_and_pad_gates(jnp.asarray(w_ih, jnp.float32).T, H, Hp)
        whh_t = _reorder_and_pad_gates(jnp.asarray(w_hh, jnp.float32).T, H, Hp)
        whh_t = _pad_axis(whh_t, 0, Hp)            # rows H -> Hp (zeros)
        if li > 0:
            wih_t = _pad_axis(wih_t, 0, Hp)        # layer>0 consumes padded hidden
        bias = _reorder_and_pad_gates(
            jnp.asarray(b_ih + b_hh, jnp.float32).reshape(1, 4 * H), H, Hp)
        prepped.append((wih_t.astype(compute_dtype),
                        whh_t.astype(compute_dtype),
                        bias))                      # bias stays f32

    w_cls, b_cls = cls_params
    C = w_cls.shape[0]
    Cp = _round_up(max(C, lane), lane)              # lane-dense classifier output
    wcls_t = _pad_axis(_pad_axis(jnp.asarray(w_cls, jnp.float32).T, 0, Hp), 1, Cp)
    bcls = jnp.full((1, Cp), _NEG, jnp.float32).at[:, :C].set(
        jnp.asarray(b_cls, jnp.float32))
    h0p = _pad_axis(jnp.asarray(h0, jnp.float32), 2, Hp)
    c0p = _pad_axis(jnp.asarray(c0, jnp.float32), 2, Hp)
    return prepped, (wcls_t, bcls, C), (h0p, c0p), compute_dtype


def rnn_forward(x, prepped_lstm, prepped_cls, h0p, c0p, *,
                inter_dtype=jnp.bfloat16, t_cap=128):
    """Mirrors RNN.forward: stacked LSTM -> Linear(last step) -> log_softmax."""
    out = x
    L = len(prepped_lstm)
    for l in range(L - 1):
        wih_t, whh_t, b = prepped_lstm[l]
        out = lstm_seq_layer(out, wih_t, whh_t, b, h0p[l], c0p[l],
                             out_dtype=inter_dtype, t_cap=t_cap)
    wih_t, whh_t, b = prepped_lstm[-1]
    wcls_t, bcls, C = prepped_cls
    # Classifier on all timesteps + out[-1] in PyTorch == classifier on the
    # last hidden state only; fused into the last layer's kernel.
    logp = lstm_last_layer(out, wih_t, whh_t, b, h0p[L - 1], c0p[L - 1],
                           wcls_t, bcls, t_cap=t_cap)
    return logp[:, :C]


# ----------------------------------------------------------------------------
# Pure-JAX reference (uses original PyTorch-layout params)
# ----------------------------------------------------------------------------
def rnn_forward_ref(x, lstm_params, cls_params, h0, c0):
    out = x
    for l, (w_ih, w_hh, b_ih, b_hh) in enumerate(lstm_params):
        H = h0.shape[-1]
        h, c = h0[l], c0[l]
        ys = []
        for t in range(out.shape[0]):
            gates = out[t] @ w_ih.T + b_ih + h @ w_hh.T + b_hh
            i_g = jax.nn.sigmoid(gates[:, 0 * H:1 * H])
            f_g = jax.nn.sigmoid(gates[:, 1 * H:2 * H])
            g_g = jnp.tanh(gates[:, 2 * H:3 * H])
            o_g = jax.nn.sigmoid(gates[:, 3 * H:4 * H])
            c = f_g * c + i_g * g_g
            h = o_g * jnp.tanh(c)
            ys.append(h)
        out = jnp.stack(ys)
    w_cls, b_cls = cls_params
    logits = out[-1] @ w_cls.T + b_cls
    return jax.nn.log_softmax(logits, axis=1)


# ----------------------------------------------------------------------------
# Deterministic parameter construction (shapes follow nn.LSTM / nn.Linear)
# ----------------------------------------------------------------------------
def make_params(key, input_size, hidden_size, num_layers, num_class):
    keys = jax.random.split(key, 4 * num_layers + 4)
    bound = 1.0 / jnp.sqrt(hidden_size)
    lstm_params = []
    for l in range(num_layers):
        d_in = input_size if l == 0 else hidden_size
        k0, k1, k2, k3 = keys[4 * l:4 * l + 4]
        w_ih = jax.random.uniform(k0, (4 * hidden_size, d_in), jnp.float32, -bound, bound)
        w_hh = jax.random.uniform(k1, (4 * hidden_size, hidden_size), jnp.float32, -bound, bound)
        b_ih = jax.random.uniform(k2, (4 * hidden_size,), jnp.float32, -bound, bound)
        b_hh = jax.random.uniform(k3, (4 * hidden_size,), jnp.float32, -bound, bound)
        lstm_params.append((w_ih, w_hh, b_ih, b_hh))
    kc0, kc1, kh, kc = keys[4 * num_layers:]
    w_cls = jax.random.uniform(kc0, (num_class, hidden_size), jnp.float32, -bound, bound)
    b_cls = jax.random.uniform(kc1, (num_class,), jnp.float32, -bound, bound)

    # TODO(synk): torch.randn + nn.init.orthogonal_ for h_0/c_0 is stochastic
    # at forward time; replaced with a deterministic QR-orthogonal stand-in.
    def ortho(k):
        a = jax.random.normal(k, (hidden_size, num_layers), jnp.float32)
        q, _ = jnp.linalg.qr(a)
        return q.T.reshape(num_layers, 1, hidden_size)

    h0 = ortho(kh)
    c0 = ortho(kc)
    return lstm_params, (w_cls, b_cls), h0, c0


# ----------------------------------------------------------------------------
if __name__ == "__main__":
    input_size, hidden_size, num_layers, num_class = 16, 32, 2, 10
    seq_len, batch = 8, 1  # nn.LSTM default layout (seq, batch, feature); h_0 forces batch=1

    key = jax.random.PRNGKey(0)
    k_x, k_p = jax.random.split(key)
    x = jax.random.normal(k_x, (seq_len, batch, input_size), jnp.float32)
    lstm_params, cls_params, h0, c0 = make_params(k_p, input_size, hidden_size,
                                                  num_layers, num_class)

    ref = rnn_forward_ref(x, lstm_params, cls_params, h0, c0)

    # (a) f32 validation mode: exact semantics check against the reference.
    #     t_cap=4 -> 2 grid steps here, exercising the streamed T-chunk
    #     pipeline and the cross-chunk h/c scratch carry.
    pp32, pc32, (h0p, c0p), id32 = prepare_params(
        lstm_params, cls_params, h0, c0, hidden_size, compute_dtype=jnp.float32)
    out32 = jax.block_until_ready(
        rnn_forward(x, pp32, pc32, h0p, c0p, inter_dtype=id32, t_cap=4))
    assert out32.shape == (batch, num_class)
    assert jnp.allclose(out32, ref, atol=1e-5, rtol=1e-5), \
        "f32 mismatch vs pure-JAX reference"

    # (b) bf16 performance mode (MXU operands + inter-layer activations bf16,
    #     f32 accumulation / gate math): loose-tolerance sanity check.
    ppbf, pcbf, (h0p, c0p), idbf = prepare_params(
        lstm_params, cls_params, h0, c0, hidden_size, compute_dtype=jnp.bfloat16)
    outbf = jax.block_until_ready(
        rnn_forward(x, ppbf, pcbf, h0p, c0p, inter_dtype=idbf, t_cap=4))
    assert outbf.shape == (batch, num_class)
    assert jnp.allclose(outbf, ref, atol=5e-2, rtol=5e-2), \
        "bf16 mismatch vs pure-JAX reference"

    print("KERNEL_OK")
</pallas_src>

<mosaic_0001>
module attributes {stable_mosaic.version = 11 : i64} {
  func.func @lstm_seq_layer_kernel(%arg0: i32, %arg1: memref<4x1x16xf32, #tpu.memory_space<vmem>>, %arg2: memref<16x512xf32, #tpu.memory_space<vmem>>, %arg3: memref<128x512xf32, #tpu.memory_space<vmem>>, %arg4: memref<1x512xf32, #tpu.memory_space<vmem>>, %arg5: memref<1x128xf32, #tpu.memory_space<vmem>>, %arg6: memref<1x128xf32, #tpu.memory_space<vmem>>, %arg7: memref<4x1x128xf32, #tpu.memory_space<vmem>>, %arg8: memref<1x128xf32, #tpu.memory_space<vmem>>, %arg9: memref<1x128xf32, #tpu.memory_space<vmem>>, %arg10: memref<4x1x512xf32, #tpu.memory_space<vmem>>) attributes {dimension_semantics = [#tpu.dimension_semantics<arbitrary>], iteration_bounds = array<i64: 2>, scalar_prefetch = 0 : i64, scratch_operands = 3 : i64, tpu.core_type = #tpu.core_type<tc>, window_params = [{transform_indices = @transform_0, window_bounds = array<i64: 4, 1, 16>}, {pipeline_mode = #tpu.pipeline_mode<synchronous>, transform_indices = @transform_1, window_bounds = array<i64: 16, 512>}, {pipeline_mode = #tpu.pipeline_mode<synchronous>, transform_indices = @transform_2, window_bounds = array<i64: 128, 512>}, {pipeline_mode = #tpu.pipeline_mode<synchronous>, transform_indices = @transform_3, window_bounds = array<i64: 1, 512>}, {pipeline_mode = #tpu.pipeline_mode<synchronous>, transform_indices = @transform_4, window_bounds = array<i64: 1, 128>}, {pipeline_mode = #tpu.pipeline_mode<synchronous>, transform_indices = @transform_5, window_bounds = array<i64: 1, 128>}, {transform_indices = @transform_6, window_bounds = array<i64: 4, 1, 128>}]} {
    %c0_i32 = arith.constant 0 : i32
    %0 = arith.cmpi eq, %arg0, %c0_i32 : i32
    %1 = arith.extui %0 : i1 to i32
    %c0_i32_0 = arith.constant 0 : i32
    %2 = arith.cmpi ne, %1, %c0_i32_0 : i32
    scf.if %2 {
      %c0_45 = arith.constant 0 : index
      %c0_46 = arith.constant 0 : index
      %117 = vector.load %arg5[%c0_45, %c0_46] : memref<1x128xf32, #tpu.memory_space<vmem>>, vector<1x128xf32>
      %c0_47 = arith.constant 0 : index
      %c0_48 = arith.constant 0 : index
      %118 = vector.load %arg8[%c0_47, %c0_48] : memref<1x128xf32, #tpu.memory_space<vmem>>, vector<1x128xf32>
      tpu.vector_store %arg8[%c0_47, %c0_48], %117 {strides = array<i32>} : memref<1x128xf32, #tpu.memory_space<vmem>>, vector<1x128xf32>,
      %c0_49 = arith.constant 0 : index
      %c0_50 = arith.constant 0 : index
      %119 = vector.load %arg6[%c0_49, %c0_50] : memref<1x128xf32, #tpu.memory_space<vmem>>, vector<1x128xf32>
      %c0_51 = arith.constant 0 : index
      %c0_52 = arith.constant 0 : index
      %120 = vector.load %arg9[%c0_51, %c0_52] : memref<1x128xf32, #tpu.memory_space<vmem>>, vector<1x128xf32>
      tpu.vector_store %arg9[%c0_51, %c0_52], %119 {strides = array<i32>} : memref<1x128xf32, #tpu.memory_space<vmem>>, vector<1x128xf32>,
    } else {
    }
    %c0 = arith.constant 0 : index
    %c0_1 = arith.constant 0 : index
    %c0_2 = arith.constant 0 : index
    %3 = vector.load %arg1[%c0, %c0_1, %c0_2] : memref<4x1x16xf32, #tpu.memory_space<vmem>>, vector<4x1x16xf32>
    %4 = vector.shape_cast %3 : vector<4x1x16xf32> to vector<4x16xf32>
    %c0_3 = arith.constant 0 : index
    %c0_4 = arith.constant 0 : index
    %5 = vector.load %arg2[%c0_3, %c0_4] : memref<16x512xf32, #tpu.memory_space<vmem>>, vector<16x512xf32>
    %cst = arith.constant dense<0.000000e+00> : vector<4x512xf32>
    %6 = tpu.matmul %4, %5, %cst {dimension_numbers = #tpu.dot_dimension_numbers<[1], [0], [0], [1], [0, 0, 1, 1], [], []>} : vector<4x16xf32>, vector<16x512xf32>, vector<4x512xf32> -> vector<4x512xf32>
    %c0_5 = arith.constant 0 : index
    %c0_6 = arith.constant 0 : index
    %7 = vector.load %arg4[%c0_5, %c0_6] : memref<1x512xf32, #tpu.memory_space<vmem>>, vector<1x512xf32>
    %8 = vector.broadcast %7 : vector<1x512xf32> to vector<4x512xf32>
    %9 = arith.addf %6, %8 : vector<4x512xf32>
    %10 = vector.shape_cast %9 : vector<4x512xf32> to vector<4x1x512xf32>
    %c0_7 = arith.constant 0 : index
    %c0_8 = arith.constant 0 : index
    %c0_9 = arith.constant 0 : index
    %11 = vector.load %arg10[%c0_7, %c0_8, %c0_9] : memref<4x1x512xf32, #tpu.memory_space<vmem>>, vector<4x1x512xf32>
    tpu.vector_store %arg10[%c0_7, %c0_8, %c0_9], %10 {strides = array<i32>} : memref<4x1x512xf32, #tpu.memory_space<vmem>>, vector<4x1x512xf32>,
    %c0_10 = arith.constant 0 : index
    %c0_11 = arith.constant 0 : index
    %12 = vector.load %arg3[%c0_10, %c0_11] : memref<128x512xf32, #tpu.memory_space<vmem>>, vector<128x512xf32>
    %c0_12 = arith.constant 0 : index
    %c0_13 = arith.constant 0 : index
    %13 = vector.load %arg8[%c0_12, %c0_13] : memref<1x128xf32, #tpu.memory_space<vmem>>, vector<1x128xf32>
    %c0_14 = arith.constant 0 : index
    %c0_15 = arith.constant 0 : index
    %14 = vector.load %arg9[%c0_14, %c0_15] : memref<1x128xf32, #tpu.memory_space<vmem>>, vector<1x128xf32>
    %c0_i32_16 = arith.constant 0 : i32
    %15 = arith.index_cast %c0_i32_16 : i32 to index
    %c0_17 = arith.constant 0 : index
    %c0_18 = arith.constant 0 : index
    %16 = vector.load %arg10[%15, %c0_17, %c0_18] : memref<4x1x512xf32, #tpu.memory_space<vmem>>, vector<1x1x512xf32>
    %17 = vector.shape_cast %16 : vector<1x1x512xf32> to vector<1x512xf32>
    %cst_19 = arith.constant dense<0.000000e+00> : vector<1x512xf32>
    %18 = tpu.matmul %13, %12, %cst_19 {dimension_numbers = #tpu.dot_dimension_numbers<[1], [0], [0], [1], [0, 0, 1, 1], [], []>} : vector<1x128xf32>, vector<128x512xf32>, vector<1x512xf32> -> vector<1x512xf32>
    %19 = arith.addf %17, %18 : vector<1x512xf32>
    %20 = vector.extract_strided_slice %19 {offsets = [0, 0], sizes = [1, 384], strides = [1, 1]} : vector<1x512xf32> to vector<1x384xf32>
    %21 = arith.negf %20 : vector<1x384xf32>
    %22 = math.exp %21 : vector<1x384xf32>
    %cst_20 = arith.constant 1.000000e+00 : f32
    %23 = vector.broadcast %cst_20 : f32 to vector<1x384xf32>
    %24 = arith.addf %23, %22 : vector<1x384xf32>
    %25 = arith.divf %23, %24 : vector<1x384xf32>
    %26 = vector.extract_strided_slice %19 {offsets = [0, 384], sizes = [1, 128], strides = [1, 1]} : vector<1x512xf32> to vector<1x128xf32>
    %27 = math.tanh %26 : vector<1x128xf32>
    %28 = vector.extract_strided_slice %25 {offsets = [0, 0], sizes = [1, 128], strides = [1, 1]} : vector<1x384xf32> to vector<1x128xf32>
    %29 = vector.extract_strided_slice %25 {offsets = [0, 128], sizes = [1, 128], strides = [1, 1]} : vector<1x384xf32> to vector<1x128xf32>
    %30 = vector.extract_strided_slice %25 {offsets = [0, 256], sizes = [1, 128], strides = [1, 1]} : vector<1x384xf32> to vector<1x128xf32>
    %31 = arith.mulf %29, %14 : vector<1x128xf32>
    %32 = arith.mulf %28, %27 : vector<1x128xf32>
    %33 = arith.addf %31, %32 : vector<1x128xf32>
    %34 = math.tanh %33 : vector<1x128xf32>
    %35 = arith.mulf %30, %34 : vector<1x128xf32>
    %36 = arith.index_cast %c0_i32_16 : i32 to index
    %c0_21 = arith.constant 0 : index
    %c0_22 = arith.constant 0 : index
    %37 = vector.load %arg7[%36, %c0_21, %c0_22] : memref<4x1x128xf32, #tpu.memory_space<vmem>>, vector<1x1x128xf32>
    %38 = vector.shape_cast %37 : vector<1x1x128xf32> to vector<1x128xf32>
    %39 = vector.shape_cast %35 : vector<1x128xf32> to vector<1x1x128xf32>
    tpu.vector_store %arg7[%36, %c0_21, %c0_22], %39 {strides = array<i32>} : memref<4x1x128xf32, #tpu.memory_space<vmem>>, vector<1x1x128xf32>,
    %c1_i32 = arith.constant 1 : i32
    %40 = arith.index_cast %c1_i32 : i32 to index
    %c0_23 = arith.constant 0 : index
    %c0_24 = arith.constant 0 : index
    %41 = vector.load %arg10[%40, %c0_23, %c0_24] : memref<4x1x512xf32, #tpu.memory_space<vmem>>, vector<1x1x512xf32>
    %42 = vector.shape_cast %41 : vector<1x1x512xf32> to vector<1x512xf32>
    %cst_25 = arith.constant dense<0.000000e+00> : vector<1x512xf32>
    %43 = tpu.matmul %35, %12, %cst_25 {dimension_numbers = #tpu.dot_dimension_numbers<[1], [0], [0], [1], [0, 0, 1, 1], [], []>} : vector<1x128xf32>, vector<128x512xf32>, vector<1x512xf32> -> vector<1x512xf32>
    %44 = arith.addf %42, %43 : vector<1x512xf32>
    %45 = vector.extract_strided_slice %44 {offsets = [0, 0], sizes = [1, 384], strides = [1, 1]} : vector<1x512xf32> to vector<1x384xf32>
    %46 = arith.negf %45 : vector<1x384xf32>
    %47 = math.exp %46 : vector<1x384xf32>
    %cst_26 = arith.constant 1.000000e+00 : f32
    %48 = vector.broadcast %cst_26 : f32 to vector<1x384xf32>
    %49 = arith.addf %48, %47 : vector<1x384xf32>
    %50 = arith.divf %48, %49 : vector<1x384xf32>
    %51 = vector.extract_strided_slice %44 {offsets = [0, 384], sizes = [1, 128], strides = [1, 1]} : vector<1x512xf32> to vector<1x128xf32>
    %52 = math.tanh %51 : vector<1x128xf32>
    %53 = vector.extract_strided_slice %50 {offsets = [0, 0], sizes = [1, 128], strides = [1, 1]} : vector<1x384xf32> to vector<1x128xf32>
    %54 = vector.extract_strided_slice %50 {offsets = [0, 128], sizes = [1, 128], strides = [1, 1]} : vector<1x384xf32> to vector<1x128xf32>
    %55 = vector.extract_strided_slice %50 {offsets = [0, 256], sizes = [1, 128], strides = [1, 1]} : vector<1x384xf32> to vector<1x128xf32>
    %56 = arith.mulf %54, %33 : vector<1x128xf32>
    %57 = arith.mulf %53, %52 : vector<1x128xf32>
    %58 = arith.addf %56, %57 : vector<1x128xf32>
    %59 = math.tanh %58 : vector<1x128xf32>
    %60 = arith.mulf %55, %59 : vector<1x128xf32>
    %61 = arith.index_cast %c1_i32 : i32 to index
    %c0_27 = arith.constant 0 : index
    %c0_28 = arith.constant 0 : index
    %62 = vector.load %arg7[%61, %c0_27, %c0_28] : memref<4x1x128xf32, #tpu.memory_space<vmem>>, vector<1x1x128xf32>
    %63 = vector.shape_cast %62 : vector<1x1x128xf32> to vector<1x128xf32>
    %64 = vector.shape_cast %60 : vector<1x128xf32> to vector<1x1x128xf32>
    tpu.vector_store %arg7[%61, %c0_27, %c0_28], %64 {strides = array<i32>} : memref<4x1x128xf32, #tpu.memory_space<vmem>>, vector<1x1x128xf32>,
    %c2_i32 = arith.constant 2 : i32
    %65 = arith.index_cast %c2_i32 : i32 to index
    %c0_29 = arith.constant 0 : index
    %c0_30 = arith.constant 0 : index
    %66 = vector.load %arg10[%65, %c0_29, %c0_30] : memref<4x1x512xf32, #tpu.memory_space<vmem>>, vector<1x1x512xf32>
    %67 = vector.shape_cast %66 : vector<1x1x512xf32> to vector<1x512xf32>
    %cst_31 = arith.constant dense<0.000000e+00> : vector<1x512xf32>
    %68 = tpu.matmul %60, %12, %cst_31 {dimension_numbers = #tpu.dot_dimension_numbers<[1], [0], [0], [1], [0, 0, 1, 1], [], []>} : vector<1x128xf32>, vector<128x512xf32>, vector<1x512xf32> -> vector<1x512xf32>
    %69 = arith.addf %67, %68 : vector<1x512xf32>
    %70 = vector.extract_strided_slice %69 {offsets = [0, 0], sizes = [1, 384], strides = [1, 1]} : vector<1x512xf32> to vector<1x384xf32>
    %71 = arith.negf %70 : vector<1x384xf32>
    %72 = math.exp %71 : vector<1x384xf32>
    %cst_32 = arith.constant 1.000000e+00 : f32
    %73 = vector.broadcast %cst_32 : f32 to vector<1x384xf32>
    %74 = arith.addf %73, %72 : vector<1x384xf32>
    %75 = arith.divf %73, %74 : vector<1x384xf32>
    %76 = vector.extract_strided_slice %69 {offsets = [0, 384], sizes = [1, 128], strides = [1, 1]} : vector<1x512xf32> to vector<1x128xf32>
    %77 = math.tanh %76 : vector<1x128xf32>
    %78 = vector.extract_strided_slice %75 {offsets = [0, 0], sizes = [1, 128], strides = [1, 1]} : vector<1x384xf32> to vector<1x128xf32>
    %79 = vector.extract_strided_slice %75 {offsets = [0, 128], sizes = [1, 128], strides = [1, 1]} : vector<1x384xf32> to vector<1x128xf32>
    %80 = vector.extract_strided_slice %75 {offsets = [0, 256], sizes = [1, 128], strides = [1, 1]} : vector<1x384xf32> to vector<1x128xf32>
    %81 = arith.mulf %79, %58 : vector<1x128xf32>
    %82 = arith.mulf %78, %77 : vector<1x128xf32>
    %83 = arith.addf %81, %82 : vector<1x128xf32>
    %84 = math.tanh %83 : vector<1x128xf32>
    %85 = arith.mulf %80, %84 : vector<1x128xf32>
    %86 = arith.index_cast %c2_i32 : i32 to index
    %c0_33 = arith.constant 0 : index
    %c0_34 = arith.constant 0 : index
    %87 = vector.load %arg7[%86, %c0_33, %c0_34] : memref<4x1x128xf32, #tpu.memory_space<vmem>>, vector<1x1x128xf32>
    %88 = vector.shape_cast %87 : vector<1x1x128xf32> to vector<1x128xf32>
    %89 = vector.shape_cast %85 : vector<1x128xf32> to vector<1x1x128xf32>
    tpu.vector_store %arg7[%86, %c0_33, %c0_34], %89 {strides = array<i32>} : memref<4x1x128xf32, #tpu.memory_space<vmem>>, vector<1x1x128xf32>,
    %c3_i32 = arith.constant 3 : i32
    %90 = arith.index_cast %c3_i32 : i32 to index
    %c0_35 = arith.constant 0 : index
    %c0_36 = arith.constant 0 : index
    %91 = vector.load %arg10[%90, %c0_35, %c0_36] : memref<4x1x512xf32, #tpu.memory_space<vmem>>, vector<1x1x512xf32>
    %92 = vector.shape_cast %91 : vector<1x1x512xf32> to vector<1x512xf32>
    %cst_37 = arith.constant dense<0.000000e+00> : vector<1x512xf32>
    %93 = tpu.matmul %85, %12, %cst_37 {dimension_numbers = #tpu.dot_dimension_numbers<[1], [0], [0], [1], [0, 0, 1, 1], [], []>} : vector<1x128xf32>, vector<128x512xf32>, vector<1x512xf32> -> vector<1x512xf32>
    %94 = arith.addf %92, %93 : vector<1x512xf32>
    %95 = vector.extract_strided_slice %94 {offsets = [0, 0], sizes = [1, 384], strides = [1, 1]} : vector<1x512xf32> to vector<1x384xf32>
    %96 = arith.negf %95 : vector<1x384xf32>
    %97 = math.exp %96 : vector<1x384xf32>
    %cst_38 = arith.constant 1.000000e+00 : f32
    %98 = vector.broadcast %cst_38 : f32 to vector<1x384xf32>
    %99 = arith.addf %98, %97 : vector<1x384xf32>
    %100 = arith.divf %98, %99 : vector<1x384xf32>
    %101 = vector.extract_strided_slice %94 {offsets = [0, 384], sizes = [1, 128], strides = [1, 1]} : vector<1x512xf32> to vector<1x128xf32>
    %102 = math.tanh %101 : vector<1x128xf32>
    %103 = vector.extract_strided_slice %100 {offsets = [0, 0], sizes = [1, 128], strides = [1, 1]} : vector<1x384xf32> to vector<1x128xf32>
    %104 = vector.extract_strided_slice %100 {offsets = [0, 128], sizes = [1, 128], strides = [1, 1]} : vector<1x384xf32> to vector<1x128xf32>
    %105 = vector.extract_strided_slice %100 {offsets = [0, 256], sizes = [1, 128], strides = [1, 1]} : vector<1x384xf32> to vector<1x128xf32>
    %106 = arith.mulf %104, %83 : vector<1x128xf32>
    %107 = arith.mulf %103, %102 : vector<1x128xf32>
    %108 = arith.addf %106, %107 : vector<1x128xf32>
    %109 = math.tanh %108 : vector<1x128xf32>
    %110 = arith.mulf %105, %109 : vector<1x128xf32>
    %111 = arith.index_cast %c3_i32 : i32 to index
    %c0_39 = arith.constant 0 : index
    %c0_40 = arith.constant 0 : index
    %112 = vector.load %arg7[%111, %c0_39, %c0_40] : memref<4x1x128xf32, #tpu.memory_space<vmem>>, vector<1x1x128xf32>
    %113 = vector.shape_cast %112 : vector<1x1x128xf32> to vector<1x128xf32>
    %114 = vector.shape_cast %110 : vector<1x128xf32> to vector<1x1x128xf32>
    tpu.vector_store %arg7[%111, %c0_39, %c0_40], %114 {strides = array<i32>} : memref<4x1x128xf32, #tpu.memory_space<vmem>>, vector<1x1x128xf32>,
    %c4_i32 = arith.constant 4 : i32
    %c0_41 = arith.constant 0 : index
    %c0_42 = arith.constant 0 : index
    %115 = vector.load %arg8[%c0_41, %c0_42] : memref<1x128xf32, #tpu.memory_space<vmem>>, vector<1x128xf32>
    tpu.vector_store %arg8[%c0_41, %c0_42], %110 {strides = array<i32>} : memref<1x128xf32, #tpu.memory_space<vmem>>, vector<1x128xf32>,
    %c0_43 = arith.constant 0 : index
    %c0_44 = arith.constant 0 : index
    %116 = vector.load %arg9[%c0_43, %c0_44] : memref<1x128xf32, #tpu.memory_space<vmem>>, vector<1x128xf32>
    tpu.vector_store %arg9[%c0_43, %c0_44], %108 {strides = array<i32>} : memref<1x128xf32, #tpu.memory_space<vmem>>, vector<1x128xf32>,
    return
  }
  func.func @transform_0(%arg0: i32) -> (i32, i32, i32) {
    %c0_i32 = arith.constant 0 : i32
    %c0_i32_0 = arith.constant 0 : i32
    %c0_i32_1 = arith.constant 0 : i32
    return %arg0, %c0_i32, %c0_i32_0 : i32, i32, i32
  }
  func.func @transform_1(%arg0: i32) -> (i32, i32) {
    %c0_i32 = arith.constant 0 : i32
    %c0_i32_0 = arith.constant 0 : i32
    %c0_i32_1 = arith.constant 0 : i32
    return %c0_i32, %c0_i32_0 : i32, i32
  }
  func.func @transform_2(%arg0: i32) -> (i32, i32) {
    %c0_i32 = arith.constant 0 : i32
    %c0_i32_0 = arith.constant 0 : i32
    %c0_i32_1 = arith.constant 0 : i32
    return %c0_i32, %c0_i32_0 : i32, i32
  }
  func.func @transform_3(%arg0: i32) -> (i32, i32) {
    %c0_i32 = arith.constant 0 : i32
    %c0_i32_0 = arith.constant 0 : i32
    %c0_i32_1 = arith.constant 0 : i32
    return %c0_i32, %c0_i32_0 : i32, i32
  }
  func.func @transform_4(%arg0: i32) -> (i32, i32) {
    %c0_i32 = arith.constant 0 : i32
    %c0_i32_0 = arith.constant 0 : i32
    %c0_i32_1 = arith.constant 0 : i32
    return %c0_i32, %c0_i32_0 : i32, i32
  }
  func.func @transform_5(%arg0: i32) -> (i32, i32) {
    %c0_i32 = arith.constant 0 : i32
    %c0_i32_0 = arith.constant 0 : i32
    %c0_i32_1 = arith.constant 0 : i32
    return %c0_i32, %c0_i32_0 : i32, i32
  }
  func.func @transform_6(%arg0: i32) -> (i32, i32, i32) {
    %c0_i32 = arith.constant 0 : i32
    %c0_i32_0 = arith.constant 0 : i32
    %c0_i32_1 = arith.constant 0 : i32
    return %arg0, %c0_i32, %c0_i32_0 : i32, i32, i32
  }
}

</mosaic_0001>

<bundles_post_ra>
// kernel: tpu_custom_call.1
= control target key start
LH: loop header
LB: loop body
LE: loop exit
PB: predicated region body
PF: predicated region fallthrough
CT: control target
= control target key end

     0   :  { %11 = vsyncpa [#allocation6], 0  ;;  %s2180_s0 = inlined_call_operand.hbm [shape: f32[8,1,16], index: 0, kind: input, shape index: {}]   ;;  %s2181_s1 = inlined_call_operand.hbm [shape: f32[16,512], index: 1, kind: input, shape index: {}]   ;;  %s2182_s2 = inlined_call_operand.hbm [shape: f32[128,512], index: 2, kind: input, shape index: {}]   ;;  %s2183_s3 = inlined_call_operand.hbm [shape: f32[1,512], index: 3, kind: input, shape index: {}]   ;;  %s2184_s4 = inlined_call_operand.vmem [shape: f32[1,128], index: 4, kind: input, shape index: {}]   ;;  %s2185_s5 = inlined_call_operand.vmem [shape: f32[1,128], index: 5, kind: input, shape index: {}]   ;;  %s2186_s6 = inlined_call_operand.hbm [shape: f32[8,1,128], index: 6, kind: output, shape index: {}]  }
   0x1   :  { %13 = vsyncpa [#allocation6 + $0x1], 0 }
   0x2   :  { %14 = vsyncpa [#allocation9], 0 }
   0x3   :  { %15 = vsyncpa [#allocation12], 0 }
   0x4   :  { %16 = vsyncpa [#allocation7], 0 }
   0x5   :  { %18 = vsyncpa [#allocation7 + $0x1], 0  ;;  %s1574_s21 = smov 0   ;;  %s1576_s22 = smov 0  }
   0x6   :  { %s1578_s23 = smov 0   ;;  %s1580_s24 = smov 0  }
   0x7 LB: > { %s1595_s25 = sadd.s32 4294967295, %s1528_s24   ;;  %s1189_s26 = sadd.s32 4294967294, %s1528_s24   ;;  %s1528_s24 = sphi %s1580_s24, %s2263_s24   ;;  %s1524_s23 = sphi %s1578_s23, %s2262_s23   ;;  %s1520_s22 = sphi %s1576_s22, %s2261_s22   ;;  %s1516_s21 = sphi %s1574_s21, %s2260_s21  }
   0x8   : > { %p44_p0 = scmp.ne.s32.totalorder %s1520_s22, %s1516_s21  ;;  %p45_p1 = scmp.eq.s32.totalorder %s1595_s25, 0 }
   0x9   : > { %p173_p2 = scmp.eq.s32.totalorder %s1595_s25, 1  ;;  %p179_p3 = scmp.eq.s32.totalorder %s1189_s26, 1 }
   0xa   : > { %p1604_p4 = por %p45_p1, %p44_p0  ;;  %p1190_p5 = scmp.ge.s32.totalorder %s1528_s24, 1 }
   0xb   : > { %p1609_p6 = por %p179_p3, %p44_p0  ;;  %p186_p7 = scmp.lt.s32.totalorder %s1528_s24, 3 }
   0xc   : > { %s197_s7 = sshll.u32 %s2181_s1, 4  ;;  %s1530_s9 = smov [#allocation8]   ;;  %s198_s7 = int_to_ptr.hbm [resolvable:$true] %s197_s7 }
   0xd   : > { %p1618_p9 = pnand %p1190_p5, %p186_p7  ;;  %s199_s10 = sshll.u32 %s1530_s9, 4  ;;  %s200_s10 = int_to_ptr.vmem [resolvable:$true] %s199_s10 }
   0xe   : > { %s211_s14 = sshll.u32 %s2182_s2, 4  ;;  %s1531_s15 = smov 512   ;;  %s212_s14 = int_to_ptr.hbm [resolvable:$true] %s211_s14 }
   0xf   : > { %p1235_p10 = pneg %p1618_p9  ;;  %s1532_s16 = smov 32  }
  0x10   : > { %s1533_s17 = smov [#allocation10]   ;;  %s226_s26 = sshll.u32 %s2183_s3, 4  ;;  %s227_s26 = int_to_ptr.hbm [resolvable:$true] %s226_s26 }
  0x11   : > { %p1626_p11 = pnand %p1235_p10, %p45_p1  ;;  %s213_s18 = sshll.u32 %s1533_s17, 4  ;;  %s214_s18 = int_to_ptr.vmem [resolvable:$true] %s213_s18 }
  0x12   : > { %s1534_s29 = smov [#allocation11]   ;;  %p38_p0 = scmp.ne.s32.totalorder %s1524_s23, %s1520_s22 }
  0x13   : > { %1238 = dma.hbm_to_vmem [thread:$0]  (!%p1626_p11), %s198_s7, 1024, %s200_s10, [#allocation9], %s1531_s15, %s1531_s15, %s1532_s16  }
  0x14   : > { %1241 = dma.hbm_to_vmem [thread:$0]  (!%p1626_p11), %s212_s14, 8192, %s214_s18, [#allocation9], %s1531_s15, %s1531_s15, %s1532_s16  }
  0x15   : > { %s228_s30 = sshll.u32 %s1534_s29, 4  ;;  %s1642_s7 = sadd.s32 1, %s1528_s24   ;;  %s229_s30 = int_to_ptr.vmem [resolvable:$true] %s228_s30 }
  0x16   : > { %1244 = dma.hbm_to_vmem [thread:$0]  (!%p1626_p11), %s227_s26, 64, %s229_s30, [#allocation12]  }
  0x17   : > { %s28_s9 = ssub.s32 %s1528_s24, %s1642_s7  ;;  %s31_s10 = sadd.s32 1, %s1524_s23 }
  0x18   : > { %p29_p13 = scmp.eq.s32.totalorder %s28_s9, 0  ;;  %p39_p3 = scmp.eq.s32.totalorder %s1528_s24, 0 }
  0x19   : > { %p1256_p5 = scmp.lt.s32.totalorder %s1528_s24, 2  ;;  %p1658_p10 = por %p173_p2, %p38_p0 }
  0x1a   : > { %s1654_s12 = scalar_select %p29_p13, %s1524_s23, %s31_s10  }
  0x1b   : > { %p40_p7 = por %p39_p3, %p38_p0  ;;  %s245_s14 = sand.u32 1, %s1524_s23  }
  0x1c   : > { %s1196_s15 = sshll.u32 %s1528_s24, 2  ;;  %s1195_s11 = sshll.u32 %s245_s14, 2 }
  0x1d   : > { %s253_s18 = scalar_lea.hbm %s2180_s0, %s1196_s15  ;;  %s249_s20 = scalar_lea.vmem [#allocation5], %s1195_s11 }
  0x1e   : > { %s254_s19 = sshll.u32 %s253_s18, 4  ;;  %s256_s26 = sshll.u32 %s249_s20, 4  ;;  %s255_s19 = int_to_ptr.hbm [resolvable:$true] %s254_s19  ;;  %s257_s26 = int_to_ptr.vmem [resolvable:$true] %s256_s26 }
  0x1f   : > { %p1669_p11 = pnand %p1256_p5, %p40_p7  ;;  %s246_s30 = scalar_lea.sflag [#allocation6], %s245_s14 }
  0x20   : > { %s1424_s9 = sshra.s32 %s255_s19, 4  ;;  %s1431_s16 = scalar_lea.hbm %s2180_s0, 8  ;;  %s1425_s9 = int_to_ptr.hbm [resolvable:$true] %s1424_s9 }
  0x21   : > { %s1426_s10 = scalar_lea.hbm %s1425_s9, 4  ;;  %p1428_p13 = pneg %p1669_p11 }
  0x22   : > { %p1427_p2 = scmp.ne.s32.totalorder %s1425_s9, %s1426_s10  ;;  %p1432_p5 = scmp.lt.s32.totalorder %s1425_s9, %s2180_s0 }
  0x23   : > { %p1433_p7 = scmp.lt.s32.totalorder %s1431_s16, %s1426_s10 }
  0x24   : > { %p1429_p0 = pnand %p1428_p13, %p1427_p2 }
  0x25   : > { %p1434_p12 = por %p1433_p7, %p1432_p5 }
  0x26   : > { %p1430_p3 = pneg %p1429_p0 }
  0x28   : > { %p1435_p8 = pnand %p1434_p12, %p1430_p3 }
  0x2a   : > { %1438 = shalt.err (!%p1435_p8)
}
  0x2b   : > { %s1535_s14 = smov 16   ;;  %s1536_s20 = smov 1  }
  0x2c   : > { %1248 = dma.hbm_to_vmem [thread:$0]  (!%p1669_p11), %s255_s19, 64, %s257_s26, %s246_s30, %s1535_s14, %s1535_s14, %s1536_s20  }
  0x2d   : > { %268 = sbr.rel (%p1618_p9) target bundleno = 837 (0x345), region = 44 }
  0x32   : > { %s1686_s15 = sand.u32 1, %s1520_s22  }
  0x33   : > { %s1198_s11 = sshll.u32 %s1686_s15, 2  ;;  %s271_s9 = scalar_lea.sflag [#allocation6], %s1686_s15 }
  0x34   : > { %s1690_s10 = scalar_lea.vmem [#allocation5], %s1198_s11 }
  0x35   : > { %1499 = dma.done.wait (%p1604_p4), %s271_s9, 64  }
  0x36   : > { %1501 = vsyncadd (%p1604_p4), %s271_s9, 4294967232 }
  0x37   : > { %1503 = dma.done.wait (%p45_p1), [#allocation9], 9216  }
  0x38   : > { %1505 = vsyncadd (%p45_p1), [#allocation9], 4294958080 }
  0x39   : > { %1507 = dma.done.wait (%p45_p1), [#allocation12], 64  }
  0x3a   : > { %1509 = vsyncadd (%p45_p1), [#allocation12], 4294967232  ;;  %s1704_s8 = scalar_lea.vmem [#allocation13], %s1198_s11  ;;  %p2215_p8 = scmp.ne.s32.totalorder %s1595_s25, 0 }
  0x3c   : > { %324 = sbr.rel (%p2215_p8) target bundleno = 68 (0x44), region = 64 }
  0x41   : > { %v325_v0 = vld [vmem:[%s2184_s4] sm:$0x1] }
  0x42   : > { %v327_v1 = vld [vmem:[%s2185_s5] sm:$0x1]  ;;  %326 = vst [vmem:[#allocation2] sm:$0x1] %v325_v0 }
  0x43   : > { %328 = vst [vmem:[#allocation3] sm:$0x1] %v327_v1 }
  0x44 PF: > { %v339_v2 = vld [vmem:[#allocation8 + $0x30] sm:$0xff]  ;;  %v340_v3 = vld [vmem:[#allocation8 + $0x38] sm:$0xff]  ;;  %v338_v8 = vld [vmem:[#allocation8 + $0x28] sm:$0xff]  ;;  %vm363_vm0 = vcmask 130048   ;;  %vm455_vm1 = vcmask 1042434   ;;  %vm461_vm2 = vcmask 1043459  }
  0x45   : > { %v335_v4 = vld [vmem:[#allocation8 + $0x10] sm:$0xff]  ;;  %420 = vmatpush.msra.mxu2 %v339_v2  ;;  %440 = vmatpush.msra.mxu3 %v340_v3  ;;  %v336_v5 = vld [vmem:[#allocation8 + $0x18] sm:$0xff]  ;;  %v337_v11 = vld [vmem:[#allocation8 + $0x20] sm:$0xff]  ;;  %vm467_vm3 = vcmask 1044484   ;;  %vm473_vm4 = vcmask 1045509   ;;  %vm459_vm5 = vcmask 1041409  }
  0x46   : > { %v1714_v6 = vld [vmem:[#allocation10 + $0x1f0] sm:$0xff]  ;;  %v1716_v7 = vld [vmem:[#allocation10 + $0x1f8] sm:$0xff]  ;;  %v334_v12 = vld [vmem:[#allocation8 + $0x8] sm:$0xff]  ;;  %400 = vmatpush.msra.mxu1 %v338_v8  ;;  %380 = vmatpush.msra.mxu0 %v337_v11  ;;  %vm453_vm6 = vcmask 1040384   ;;  %vm463_vm7 = vcmask 1042433   ;;  %vm469_vm8 = vcmask 1043458  }
  0x47   : > { %421 = vmatpush.msra.mxu2 %v335_v4  ;;  %441 = vmatpush.msra.mxu3 %v336_v5  ;;  %v1718_v9 = vld [vmem:[#allocation10 + $0x1d0] sm:$0xff]  ;;  %v1720_v10 = vld [vmem:[#allocation10 + $0x1d8] sm:$0xff]  ;;  %v333_v15 = vld [vmem:[#allocation8] sm:$0xff]  ;;  %vm475_vm9 = vcmask 1044483   ;;  %vm457_vm11 = vcmask 1041408   ;;  %s1216_s30 = sshll.u32 %s1595_s25, 2 }
  0x48   : > { %v1724_v13 = vld [vmem:[#allocation10 + $0x1b0] sm:$0xff]  ;;  %v1726_v14 = vld [vmem:[#allocation10 + $0x1b8] sm:$0xff]  ;;  %v1730_v16 = vld [vmem:[#allocation10 + $0x1e8] sm:$0xff]  ;;  %401 = vmatpush.msra.mxu1 %v334_v12  ;;  %381 = vmatpush.msra.mxu0 %v333_v15  ;;  %s1083_s18 = scalar_lea.hbm %s2186_s6, %s1216_s30  ;;  %s1084_s14 = sshll.u32 %s1704_s8, 4  ;;  %s1085_s14 = int_to_ptr.vmem [resolvable:$true] %s1084_s14 }
  0x49   : > { %597 = vmatpush.msrb.mxu2 %v1714_v6  ;;  %617 = vmatpush.msrb.mxu3 %v1716_v7  ;;  %v1732_v17 = vld [vmem:[#allocation10 + $0x1e0] sm:$0xff]  ;;  %v1734_v18 = vld [vmem:[#allocation10 + $0x190] sm:$0xff]  ;;  %v1736_v19 = vld [vmem:[#allocation10 + $0x198] sm:$0xff]  ;;  %s1086_s20 = sshll.u32 %s1083_s18, 4  ;;  %s1073_s11 = scalar_lea.sflag [#allocation7], %s1686_s15  ;;  %s1087_s20 = int_to_ptr.hbm [resolvable:$true] %s1086_s20 }
  0x4a   : > { %v1740_v20 = vld [vmem:[#allocation10 + $0x1c8] sm:$0xff]  ;;  %v1742_v21 = vld [vmem:[#allocation10 + $0x1c0] sm:$0xff]  ;;  %577 = vmatpush.msrb.mxu1 %v1730_v16  ;;  %557 = vmatpush.msrb.mxu0 %v1732_v17  ;;  %v1746_v22 = vld [vmem:[#allocation10 + $0x170] sm:$0xff]  ;;  %s1468_s9 = sshra.s32 %s1087_s20, 4  ;;  %s1474_s27 = scalar_lea.hbm %s2186_s6, 8  ;;  %s1469_s9 = int_to_ptr.hbm [resolvable:$true] %s1468_s9 }
  0x4b   : > { %598 = vmatpush.msrb.mxu2 %v1718_v9  ;;  %618 = vmatpush.msrb.mxu3 %v1720_v10  ;;  %v1748_v23 = vld [vmem:[#allocation10 + $0x178] sm:$0xff]  ;;  %v1752_v24 = vld [vmem:[#allocation10 + $0x1a8] sm:$0xff]  ;;  %v1754_v25 = vld [vmem:[#allocation10 + $0x1a0] sm:$0xff]  ;;  %s1470_s25 = scalar_lea.hbm %s1469_s9, 4  ;;  %p1475_p12 = scmp.lt.s32.totalorder %s1469_s9, %s2186_s6 }
  0x4c   : > { %578 = vmatpush.msrb.mxu1 %v1740_v20  ;;  %558 = vmatpush.msrb.mxu0 %v1742_v21  ;;  %v1758_v26 = vld [vmem:[#allocation10 + $0x150] sm:$0xff]  ;;  %v1760_v27 = vld [vmem:[#allocation10 + $0x158] sm:$0xff]  ;;  %v1764_v28 = vld [vmem:[#allocation10 + $0x188] sm:$0xff]  ;;  %p1471_p1 = scmp.ne.s32.totalorder %s1469_s9, %s1470_s25  ;;  %p1476_p11 = scmp.lt.s32.totalorder %s1474_s27, %s1470_s25 }
  0x4d   : > { %599 = vmatpush.msrb.mxu2 %v1724_v13  ;;  %619 = vmatpush.msrb.mxu3 %v1726_v14  ;;  %v1766_v29 = vld [vmem:[#allocation10 + $0x180] sm:$0xff]  ;;  %v1770_v30 = vld [vmem:[#allocation10 + $0x130] sm:$0xff]  ;;  %v1772_v31 = vld [vmem:[#allocation10 + $0x138] sm:$0xff] }
  0x4e   : > { %579 = vmatpush.msrb.mxu1 %v1752_v24  ;;  %559 = vmatpush.msrb.mxu0 %v1754_v25  ;;  %v1774_v32 = vld [vmem:[#allocation10 + $0x168] sm:$0xff]  ;;  %v1778_v33 = vld [vmem:[#allocation10 + $0x110] sm:$0xff]  ;;  %v1780_v34 = vld [vmem:[#allocation10 + $0x118] sm:$0xff]  ;;  %p1472_p4 = pnand %p1471_p1, %p1658_p10  ;;  %p1477_p2 = por %p1476_p11, %p1475_p12 }
  0x4f   : > { %600 = vmatpush.msrb.mxu2 %v1734_v18  ;;  %620 = vmatpush.msrb.mxu3 %v1736_v19  ;;  %v1782_v35 = vld [vmem:[#allocation10 + $0x160] sm:$0xff]  ;;  %v329_v36 = vld [vmem:[%s1690_s10] sm:$0x1]  ;;  %v330_v37 = vld [vmem:[%s1690_s10 + $0x1] sm:$0x1] }
  0x50   : > { %580 = vmatpush.msrb.mxu1 %v1764_v28  ;;  %560 = vmatpush.msrb.mxu0 %v1766_v29  ;;  %v331_v38 = vld [vmem:[%s1690_s10 + $0x2] sm:$0x1]  ;;  %v1791_v39 = vld [vmem:[#allocation10 + $0x148] sm:$0xff]  ;;  %v1793_v40 = vld [vmem:[#allocation10 + $0x140] sm:$0xff]  ;;  %355 = vst [vmem:[#allocation1] ss:$9 sm:$0xff] %v329_v36  ;;  %p1473_p9 = pneg %p1472_p4 }
  0x51   : > { %601 = vmatpush.msrb.mxu2 %v1746_v22  ;;  %621 = vmatpush.msrb.mxu3 %v1748_v23  ;;  %v332_v41 = vld [vmem:[%s1690_s10 + $0x3] sm:$0x1]  ;;  %v1798_v42 = vld [vmem:[#allocation10 + $0xf0] sm:$0xff]  ;;  %357 = vst [vmem:[#allocation1 + $0x1] ss:$9 sm:$0xff] %v330_v37  ;;  %v1804_v44 = vld [vmem:[#allocation10 + $0x128] sm:$0xff] }
  0x52   : > { %581 = vmatpush.msrb.mxu1 %v1774_v32  ;;  %561 = vmatpush.msrb.mxu0 %v1782_v35  ;;  %v1800_v43 = vld [vmem:[#allocation10 + $0xf8] sm:$0xff]  ;;  %v1806_v45 = vld [vmem:[#allocation10 + $0x120] sm:$0xff]  ;;  %359 = vst [vmem:[#allocation1 + $0x2] ss:$9 sm:$0xff] %v331_v38  ;;  %v1810_v46 = vld [vmem:[#allocation10 + $0xd0] sm:$0xff]  ;;  %p1478_p13 = pnand %p1477_p2, %p1473_p9 }
  0x53   : > { %602 = vmatpush.msrb.mxu2 %v1758_v26  ;;  %622 = vmatpush.msrb.mxu3 %v1760_v27  ;;  %v1812_v47 = vld [vmem:[#allocation10 + $0xd8] sm:$0xff]  ;;  %361 = vst [vmem:[#allocation1 + $0x3] ss:$9 sm:$0xff] %v332_v41  ;;  %v1816_v48 = vld [vmem:[#allocation10 + $0x108] sm:$0xff]  ;;  %v1818_v49 = vld [vmem:[#allocation10 + $0x100] sm:$0xff] }
  0x54   : > { %582 = vmatpush.msrb.mxu1 %v1791_v39  ;;  %562 = vmatpush.msrb.mxu0 %v1793_v40  ;;  %v1822_v50 = vld [vmem:[#allocation10 + $0xb0] sm:$0xff]  ;;  %v1824_v51 = vld [vmem:[#allocation10 + $0xb8] sm:$0xff]  ;;  %v1828_v52 = vld [vmem:[#allocation10 + $0xe8] sm:$0xff] }
  0x55   : > { %603 = vmatpush.msrb.mxu2 %v1770_v30  ;;  %623 = vmatpush.msrb.mxu3 %v1772_v31  ;;  %v1830_v53 = vld [vmem:[#allocation10 + $0xe0] sm:$0xff]  ;;  %v1834_v54 = vld [vmem:[#allocation10 + $0x90] sm:$0xff]  ;;  %v1836_v55 = vld [vmem:[#allocation10 + $0x98] sm:$0xff] }
  0x56   : > { %583 = vmatpush.msrb.mxu1 %v1804_v44  ;;  %563 = vmatpush.msrb.mxu0 %v1806_v45  ;;  %2216 = vst [vmem:[#allocation18_spill] sm:$0xff] %v1834_v54  ;;  %v1842_v56 = vld [vmem:[#allocation10 + $0xc8] sm:$0xff]  ;;  %v1844_v57 = vld [vmem:[#allocation10 + $0x70] sm:$0xff]  ;;  %v1848_v59 = vld [vmem:[#allocation10 + $0x78] sm:$0xff] }
  0x57   : > { %604 = vmatpush.msrb.mxu2 %v1778_v33  ;;  %624 = vmatpush.msrb.mxu3 %v1780_v34  ;;  %2217 = vst [vmem:[#allocation19_spill] sm:$0xff] %v1836_v55  ;;  %v1850_v60 = vld [vmem:[#allocation10 + $0xc0] sm:$0xff]  ;;  %v1854_v61 = vld [vmem:[#allocation10 + $0xa8] sm:$0xff]  ;;  %v1856_v62 = vld [vmem:[#allocation10 + $0x50] sm:$0xff] }
  0x58   : > { %584 = vmatpush.msrb.mxu1 %v1816_v48  ;;  %564 = vmatpush.msrb.mxu0 %v1818_v49  ;;  %2218 = vst [vmem:[#allocation20_spill] sm:$0xff] %v1844_v57  ;;  %v1860_v63 = vld [vmem:[#allocation10 + $0x58] sm:$0xff]  ;;  %v1864_v0 = vld [vmem:[#allocation10 + $0xa0] sm:$0xff]  ;;  %v1866_v1 = vld [vmem:[#allocation10 + $0x88] sm:$0xff] }
  0x59   : > { %605 = vmatpush.msrb.mxu2 %v1798_v42  ;;  %625 = vmatpush.msrb.mxu3 %v1800_v43  ;;  %2219 = vst [vmem:[#allocation21_spill] sm:$0xff] %v1848_v59  ;;  %v1870_v2 = vld [vmem:[#allocation10 + $0x30] sm:$0xff]  ;;  %v1872_v3 = vld [vmem:[#allocation10 + $0x38] sm:$0xff]  ;;  %v1876_v4 = vld [vmem:[#allocation10 + $0x68] sm:$0xff] }
  0x5a   : > { %585 = vmatpush.msrb.mxu1 %v1828_v52  ;;  %565 = vmatpush.msrb.mxu0 %v1830_v53  ;;  %v362_v58 = vld [vmem:[#allocation1] sm:$0xff]  ;;  %2220 = vst [vmem:[#allocation22_spill] sm:$0xff] %v1856_v62  ;;  %v1882_v8 = vld [vmem:[#allocation10 + $0x10] sm:$0xff]  ;;  %v554_v12 = vld [vmem:[#allocation2] sm:$0x1] }
  0x5b   : > { %606 = vmatpush.msrb.mxu2 %v1810_v46  ;;  %626 = vmatpush.msrb.mxu3 %v1812_v47  ;;  %2221 = vst [vmem:[#allocation23_spill] sm:$0xff] %v1860_v63  ;;  %v1880_v5 = vld [vmem:[#allocation10 + $0x80] sm:$0xff]  ;;  %v1886_v11 = vld [vmem:[#allocation10 + $0x18] sm:$0xff]  ;;  %v1894_v36 = vld [vmem:[#allocation10 + $0x48] sm:$0xff] }
  0x5c   : > { %1206 = vmatmul.msk.f32.vlgmr.msra.gmra.mxu2 %vm363_vm0, %v362_v58  ;;  %1207 = vmatmul.msk.f32.vlgmr.msra.gmra.mxu3 %vm363_vm0, %v362_v58  ;;  %2222 = vst [vmem:[#allocation24_spill] sm:$0xff] %v1866_v1  ;;  %v1890_v15 = vld [vmem:[#allocation10 + $0x60] sm:$0xff]  ;;  %v1900_v38 = vld [vmem:[#allocation10 + $0x28] sm:$0xff] }
  0x5d   : > { %607 = vmatpush.msrb.mxu2 %v1822_v50  ;;  %627 = vmatpush.msrb.mxu3 %v1824_v51  ;;  %2223 = vst [vmem:[#allocation25_spill] sm:$0xff] %v1870_v2  ;;  %v1897_v37 = vld [vmem:[#allocation10 + $0x40] sm:$0xff] }
  0x5e   : > { %586 = vmatpush.msrb.mxu1 %v1842_v56  ;;  %566 = vmatpush.msrb.mxu0 %v1850_v60  ;;  %2224 = vst [vmem:[#allocation26_spill] sm:$0xff] %v1872_v3  ;;  %v1903_v41 = vld [vmem:[#allocation10 + $0x20] sm:$0xff] }
  0x5f   : > { %608 = vmatpush.msrb.mxu2 %v1834_v54  ;;  %628 = vmatpush.msrb.mxu3 %v1836_v55  ;;  %2225 = vst [vmem:[#allocation27_spill] sm:$0xff] %v1876_v4 }
  0x60   : > { %587 = vmatpush.msrb.mxu1 %v1854_v61  ;;  %567 = vmatpush.msrb.mxu0 %v1864_v0  ;;  %2226 = vst [vmem:[#allocation28_spill] sm:$0xff] %v1880_v5 }
  0x61   : > { %609 = vmatpush.msrb.mxu2 %v1844_v57  ;;  %629 = vmatpush.msrb.mxu3 %v1848_v59  ;;  %2227 = vst [vmem:[#allocation29_spill] sm:$0xff] %v1882_v8 }
  0x62   : > { %1205 = vmatmul.msk.f32.vlgmr.msra.gmra.mxu1 %vm363_vm0, %v362_v58  ;;  %2228 = vst [vmem:[#allocation30_spill] sm:$0xff] %v1886_v11  ;;  %1204 = vmatmul.msk.f32.vlgmr.msra.gmra.mxu0 %vm363_vm0, %v362_v58  ;;  %v1907_v58 = vld [vmem:[#allocation10 + $0x8] sm:$0xff] }
  0x63   : > { %610 = vmatpush.msrb.mxu2 %v1856_v62  ;;  %630 = vmatpush.msrb.mxu3 %v1860_v63  ;;  %2229 = vst [vmem:[#allocation31_spill] sm:$0xff] %v1890_v15 }
  0x64   : > { %588 = vmatpush.msrb.mxu1 %v1866_v1  ;;  %568 = vmatpush.msrb.mxu0 %v1880_v5  ;;  %2230 = vst [vmem:[#allocation32_spill] sm:$0xff] %v1894_v36 }
  0x65   : > { %611 = vmatpush.msrb.mxu2 %v1870_v2  ;;  %631 = vmatpush.msrb.mxu3 %v1872_v3  ;;  %2231 = vst [vmem:[#allocation33_spill] sm:$0xff] %v1897_v37 }
  0x66   : > { %589 = vmatpush.msrb.mxu1 %v1876_v4  ;;  %569 = vmatpush.msrb.mxu0 %v1890_v15  ;;  %2232 = vst [vmem:[#allocation34_spill] sm:$0xff] %v1900_v38 }
  0x67   : > { %612 = vmatpush.msrb.mxu2 %v1882_v8  ;;  %632 = vmatpush.msrb.mxu3 %v1886_v11  ;;  %2233 = vst [vmem:[#allocation35_spill] sm:$0xff] %v1903_v41  ;;  %v1911_v11 = vld [vmem:[#allocation10] sm:$0xff] }
  0x68   : > { %613 = vmatmul.f32.vlgmr.msrb.gmra.mxu2 %v554_v12  ;;  %633 = vmatmul.f32.vlgmr.msrb.gmra.mxu3 %v554_v12  ;;  %2234 = vst [vmem:[#allocation36_spill] sm:$0xff] %v1907_v58 }
  0x69   : > { %590 = vmatpush.msrb.mxu1 %v1894_v36  ;;  %725 = vmatpush.msra.mxu2 %v1714_v6  ;;  %2235 = vst [vmem:[#allocation37_spill] sm:$0xff] %v1911_v11 }
  0x6a   : > { %570 = vmatpush.msrb.mxu0 %v1897_v37  ;;  %745 = vmatpush.msra.mxu3 %v1716_v7 }
  0x6b   : > { %591 = vmatpush.msrb.mxu1 %v1900_v38  ;;  %726 = vmatpush.msra.mxu2 %v1718_v9 }
  0x6c   : > { %571 = vmatpush.msrb.mxu0 %v1903_v41  ;;  %746 = vmatpush.msra.mxu3 %v1720_v10 }
  0x6d   : > { %592 = vmatpush.msrb.mxu1 %v1907_v58  ;;  %727 = vmatpush.msra.mxu2 %v1724_v13 }
  0x6e   : > { %593 = vmatmul.f32.vlgmr.msrb.gmra.mxu1 %v554_v12  ;;  %572 = vmatpush.msrb.mxu0 %v1911_v11 }
  0x6f   : > { %573 = vmatmul.f32.vlgmr.msrb.gmra.mxu0 %v554_v12  ;;  %705 = vmatpush.msra.mxu1 %v1730_v16  ;;  %v2236_v12 = vld [vmem:[#allocation30_spill] sm:$0xff] }
  0x70   : > { %685 = vmatpush.msra.mxu0 %v1732_v17  ;;  %747 = vmatpush.msra.mxu3 %v1726_v14 }
  0x71   : > { %706 = vmatpush.msra.mxu1 %v1740_v20  ;;  %728 = vmatpush.msra.mxu2 %v1734_v18 }
  0x72   : > { %686 = vmatpush.msra.mxu0 %v1742_v21  ;;  %748 = vmatpush.msra.mxu3 %v1736_v19 }
  0x73   : > { %707 = vmatpush.msra.mxu1 %v1752_v24  ;;  %729 = vmatpush.msra.mxu2 %v1746_v22 }
  0x74   : > { %687 = vmatpush.msra.mxu0 %v1754_v25  ;;  %749 = vmatpush.msra.mxu3 %v1748_v23 }
  0x75   : > { %708 = vmatpush.msra.mxu1 %v1764_v28  ;;  %730 = vmatpush.msra.mxu2 %v1758_v26 }
  0x76   : > { %688 = vmatpush.msra.mxu0 %v1766_v29  ;;  %750 = vmatpush.msra.mxu3 %v1760_v27 }
  0x77   : > { %709 = vmatpush.msra.mxu1 %v1774_v32  ;;  %731 = vmatpush.msra.mxu2 %v1770_v30 }
  0x78   : > { %689 = vmatpush.msra.mxu0 %v1782_v35  ;;  %751 = vmatpush.msra.mxu3 %v1772_v31 }
  0x79   : > { %710 = vmatpush.msra.mxu1 %v1791_v39  ;;  %732 = vmatpush.msra.mxu2 %v1778_v33 }
  0x7a   : > { %690 = vmatpush.msra.mxu0 %v1793_v40  ;;  %752 = vmatpush.msra.mxu3 %v1780_v34 }
  0x7b   : > { %711 = vmatpush.msra.mxu1 %v1804_v44  ;;  %733 = vmatpush.msra.mxu2 %v1798_v42 }
  0x7c   : > { %691 = vmatpush.msra.mxu0 %v1806_v45  ;;  %753 = vmatpush.msra.mxu3 %v1800_v43 }
  0x7d   : > { %712 = vmatpush.msra.mxu1 %v1816_v48  ;;  %734 = vmatpush.msra.mxu2 %v1810_v46 }
  0x7e   : > { %692 = vmatpush.msra.mxu0 %v1818_v49  ;;  %754 = vmatpush.msra.mxu3 %v1812_v47 }
  0x7f   : > { %713 = vmatpush.msra.mxu1 %v1828_v52  ;;  %735 = vmatpush.msra.mxu2 %v1822_v50 }
  0x80   : > { %693 = vmatpush.msra.mxu0 %v1830_v53  ;;  %755 = vmatpush.msra.mxu3 %v1824_v51 }
  0x81   : > { %714 = vmatpush.msra.mxu1 %v1842_v56  ;;  %736 = vmatpush.msra.mxu2 %v1834_v54 }
  0x82   : > { %694 = vmatpush.msra.mxu0 %v1850_v60  ;;  %756 = vmatpush.msra.mxu3 %v1836_v55 }
  0x83   : > { %715 = vmatpush.msra.mxu1 %v1854_v61  ;;  %737 = vmatpush.msra.mxu2 %v1844_v57 }
  0x84   : > { %695 = vmatpush.msra.mxu0 %v1864_v0  ;;  %757 = vmatpush.msra.mxu3 %v1848_v59 }
  0x85   : > { %716 = vmatpush.msra.mxu1 %v1866_v1  ;;  %738 = vmatpush.msra.mxu2 %v1856_v62 }
  0x86   : > { %696 = vmatpush.msra.mxu0 %v1880_v5  ;;  %758 = vmatpush.msra.mxu3 %v1860_v63 }
  0x87   : > { %717 = vmatpush.msra.mxu1 %v1876_v4  ;;  %739 = vmatpush.msra.mxu2 %v1870_v2 }
  0x88   : > { %697 = vmatpush.msra.mxu0 %v1890_v15  ;;  %759 = vmatpush.msra.mxu3 %v1872_v3 }
  0x89   : > { %718 = vmatpush.msra.mxu1 %v1894_v36  ;;  %740 = vmatpush.msra.mxu2 %v1882_v8 }
  0x8a   : > { %698 = vmatpush.msra.mxu0 %v1897_v37  ;;  %760 = vmatpush.msra.mxu3 %v2236_v12 }
  0x8b   : > { %719 = vmatpush.msra.mxu1 %v1900_v38  ;;  %854 = vmatpush.msrb.mxu2 %v1714_v6 }
  0x8c   : > { %699 = vmatpush.msra.mxu0 %v1903_v41  ;;  %874 = vmatpush.msrb.mxu3 %v1716_v7 }
  0x8d   : > { %720 = vmatpush.msra.mxu1 %v1907_v58  ;;  %855 = vmatpush.msrb.mxu2 %v1718_v9 }
  0x8e   : > { %700 = vmatpush.msra.mxu0 %v1911_v11  ;;  %875 = vmatpush.msrb.mxu3 %v1720_v10 }
  0x8f   : > { %834 = vmatpush.msrb.mxu1 %v1730_v16  ;;  %856 = vmatpush.msrb.mxu2 %v1724_v13 }
  0x90   : > { %814 = vmatpush.msrb.mxu0 %v1732_v17  ;;  %876 = vmatpush.msrb.mxu3 %v1726_v14 }
  0x91   : > { %835 = vmatpush.msrb.mxu1 %v1740_v20  ;;  %857 = vmatpush.msrb.mxu2 %v1734_v18 }
  0x92   : > { %815 = vmatpush.msrb.mxu0 %v1742_v21  ;;  %877 = vmatpush.msrb.mxu3 %v1736_v19 }
  0x93   : > { %836 = vmatpush.msrb.mxu1 %v1752_v24  ;;  %858 = vmatpush.msrb.mxu2 %v1746_v22 }
  0x94   : > { %816 = vmatpush.msrb.mxu0 %v1754_v25  ;;  %878 = vmatpush.msrb.mxu3 %v1748_v23 }
  0x95   : > { %837 = vmatpush.msrb.mxu1 %v1764_v28  ;;  %859 = vmatpush.msrb.mxu2 %v1758_v26 }
  0x96   : > { %817 = vmatpush.msrb.mxu0 %v1766_v29  ;;  %879 = vmatpush.msrb.mxu3 %v1760_v27 }
  0x97   : > { %838 = vmatpush.msrb.mxu1 %v1774_v32  ;;  %860 = vmatpush.msrb.mxu2 %v1770_v30 }
  0x98   : > { %818 = vmatpush.msrb.mxu0 %v1782_v35  ;;  %880 = vmatpush.msrb.mxu3 %v1772_v31 }
  0x99   : > { %839 = vmatpush.msrb.mxu1 %v1791_v39  ;;  %861 = vmatpush.msrb.mxu2 %v1778_v33 }
  0x9a   : > { %819 = vmatpush.msrb.mxu0 %v1793_v40  ;;  %881 = vmatpush.msrb.mxu3 %v1780_v34 }
  0x9b   : > { %840 = vmatpush.msrb.mxu1 %v1804_v44  ;;  %862 = vmatpush.msrb.mxu2 %v1798_v42 }
  0x9c   : > { %820 = vmatpush.msrb.mxu0 %v1806_v45  ;;  %882 = vmatpush.msrb.mxu3 %v1800_v43 }
  0x9d   : > { %841 = vmatpush.msrb.mxu1 %v1816_v48  ;;  %863 = vmatpush.msrb.mxu2 %v1810_v46 }
  0x9e   : > { %821 = vmatpush.msrb.mxu0 %v1818_v49  ;;  %883 = vmatpush.msrb.mxu3 %v1812_v47 }
  0x9f   : > { %842 = vmatpush.msrb.mxu1 %v1828_v52  ;;  %864 = vmatpush.msrb.mxu2 %v1822_v50 }
  0xa0   : > { %822 = vmatpush.msrb.mxu0 %v1830_v53  ;;  %884 = vmatpush.msrb.mxu3 %v1824_v51 }
  0xa1   : > { %843 = vmatpush.msrb.mxu1 %v1842_v56  ;;  %865 = vmatpush.msrb.mxu2 %v1834_v54 }
  0xa2   : > { %823 = vmatpush.msrb.mxu0 %v1850_v60  ;;  %885 = vmatpush.msrb.mxu3 %v1836_v55 }
  0xa3   : > { %844 = vmatpush.msrb.mxu1 %v1854_v61  ;;  %866 = vmatpush.msrb.mxu2 %v1844_v57 }
  0xa4   : > { %824 = vmatpush.msrb.mxu0 %v1864_v0  ;;  %886 = vmatpush.msrb.mxu3 %v1848_v59 }
  0xa5   : > { %845 = vmatpush.msrb.mxu1 %v1866_v1  ;;  %867 = vmatpush.msrb.mxu2 %v1856_v62 }
  0xa6   : > { %825 = vmatpush.msrb.mxu0 %v1880_v5  ;;  %887 = vmatpush.msrb.mxu3 %v1860_v63  ;;  %v341_v63 = vld [vmem:[#allocation11] sm:$0xf] }
  0xa7   : > { %846 = vmatpush.msrb.mxu1 %v1876_v4  ;;  %868 = vmatpush.msrb.mxu2 %v1870_v2  ;;  %v344_v62 = vperm.slane %v341_v63, 1  ;;  %v346_v2 = vperm.slane %v341_v63, 3 }
  0xa8   : > { %826 = vmatpush.msrb.mxu0 %v1890_v15  ;;  %888 = vmatpush.msrb.mxu3 %v1872_v3  ;;  %v482_v3 = vlaneseq }
  0xa9   : > { %847 = vmatpush.msrb.mxu1 %v1894_v36  ;;  %869 = vmatpush.msrb.mxu2 %v1882_v8  ;;  %v345_v36 = vperm.slane %v341_v63, 2 }
  0xaa   : > { %827 = vmatpush.msrb.mxu0 %v1897_v37  ;;  %889 = vmatpush.msrb.mxu3 %v2236_v12  ;;  %v343_v37 = vperm.slane %v341_v63, 0  ;;  %vm2042_vm10 = vcmp.lt.s32.totalorder %v482_v3, 512 }
  0xab   : > { %848 = vmatpush.msrb.mxu1 %v1900_v38 }
  0xac   : > { %828 = vmatpush.msrb.mxu0 %v1903_v41 }
  0xad   : > { %849 = vmatpush.msrb.mxu1 %v1907_v58 }
  0xae   : > { %829 = vmatpush.msrb.mxu0 %v1911_v11 }
  0xdf   : > { %v403_v59 = vpop.f32.mrf.mxu1  ;;  %v423_v38 = vpop.f32.mrf.mxu2 }
  0xe0   : > { %v404_v57 = vadd.f32 %v403_v59, %v344_v62  ;;  %v443_v4 = vpop.f32.mrf.mxu3  ;;  %v424_v8 = vadd.f32 %v423_v38, %v345_v36  ;;  %v383_v41 = vpop.f32.mrf.mxu0 }
  0xe1   : > { %v444_v58 = vadd.f32 %v443_v4, %v346_v2  ;;  %v384_v11 = vadd.f32 %v383_v41, %v343_v37 }
  0xe2   : > { %v450_v12 = vrot.slane %v404_v57, 7  ;;  %v451_v15 = vrot.slane %v424_v8, 6 }
  0xe3   : > { %v452_v63 = vrot.slane %v444_v58, 5 }
  0xe4   : > { %v460_v62 = vsel %vm459_vm5, %v384_v11, %v450_v12  ;;  %v466_v55 = vsel %vm455_vm1, %v384_v11, %v450_v12  ;;  %v472_v57 = vsel %vm461_vm2, %v384_v11, %v450_v12  ;;  %v454_v2 = vsel %vm453_vm6, %v384_v11, %v450_v12 }
  0xe5   : > { %v456_v4 = vsel %vm455_vm1, %v451_v15, %v452_v63  ;;  %v462_v36 = vsel %vm461_vm2, %v451_v15, %v452_v63  ;;  %v468_v37 = vsel %vm467_vm3, %v451_v15, %v452_v63  ;;  %v474_v8 = vsel %vm473_vm4, %v451_v15, %v452_v63 }
  0xe6   : > { %v464_v3 = vsel %vm463_vm7, %v460_v62, %v462_v36  ;;  %v470_v38 = vsel %vm469_vm8, %v466_v55, %v468_v37  ;;  %v476_v41 = vsel %vm475_vm9, %v472_v57, %v474_v8  ;;  %v458_v58 = vsel %vm457_vm11, %v454_v2, %v456_v4 }
  0xe7   : > { %v465_v54 = vrot.slane %v464_v3, 1  ;;  %v471_v1 = vrot.slane %v470_v38, 2  ;;  %v477_v5 = vrot.slane %v476_v41, 3  ;;  %486 = vst.msk [vmem:[#allocation4] sm:$0xf] %vm2042_vm10, %v458_v58 }
  0xe9   : > { %487 = vst.msk [vmem:[#allocation4 + $0x4] sm:$0xf] %vm2042_vm10, %v465_v54 }
  0xea   : > { %488 = vst.msk [vmem:[#allocation4 + $0x8] sm:$0xf] %vm2042_vm10, %v471_v1 }
  0xeb   : > { %v614_v11 = vpop.f32.mrf.mxu2  ;;  %v594_v12 = vpop.f32.mrf.mxu1  ;;  %489 = vst.msk [vmem:[#allocation4 + $0xc] sm:$0xf] %vm2042_vm10, %v477_v5 }
  0xec   : > { %v642_v15 = vrot.slane %v614_v11, 6  ;;  %v634_v63 = vpop.f32.mrf.mxu3  ;;  %v641_v55 = vrot.slane %v594_v12, 7  ;;  %v574_v57 = vpop.f32.mrf.mxu0 }
  0xed   : > { %v643_v62 = vrot.slane %v634_v63, 5 }
  0xee   : > { %v644_v4 = vsel %vm453_vm6, %v574_v57, %v641_v55  ;;  %v556_v36 = vld [vmem:[#allocation4] sm:$0xf] }
  0xef   : > { %v645_v2 = vsel %vm455_vm1, %v642_v15, %v643_v62  ;;  %v555_v62 = vld [vmem:[#allocation3] sm:$0x1] }
  0xf0   : > { %v646_v54 = vsel %vm457_vm11, %v644_v4, %v645_v2 }
  0xf1   : > { %v648_v37 = vadd.f32 %v646_v54, %v556_v36 }
  0xf3   : > { %v1208_v8 = vmul.f32 -1.442695, %v648_v37  ;;  %v669_v59 = vrot.slane %v648_v37, 3 }
  0xf5   : > { %1302 = vpow2.f32 %v1208_v8 }
  0xfb   : > { %v1303_v1 = vpop.eup %1302 }
  0xfc   : > { %v652_v3 = vadd.f32 1.0, %v1303_v1 }
  0xfe   : > { %1304 = vrcp.f32 %v652_v3  ;;  %v664_v58 = vand.u32 2147483648, %v652_v3  ;;  %v662_v12 = vand.u32 2147483647, %v652_v3  ;;  %vm658_vm13 = vweird.f32 %v652_v3 }
  0xff   : > { %1306 = vtanh.f32 %v669_v59 }
 0x100   : > { %v665_v63 = vor.u32 1.1754944e-38, %v664_v58  ;;  %vm663_vm15 = vcmp.eq.f32.partialorder %v662_v12, 8.507059e+37 }
 0x104   : > { %v1305_v38 = vpop.eup %1304 }
 0x105   : > { %v654_v41 = vmul.f32 %v1305_v38, %v652_v3  ;;  %vm659_vm12 = vweird.f32 %v1305_v38  ;;  %v1307_v4 = vpop.eup %1306 }
 0x106   : > { %vm660_vm14 = vmor %vm658_vm13, %vm659_vm12 }
 0x107   : > { %v655_v5 = vsub.f32 1.0, %v654_v41 }
 0x109   : > { %v656_v11 = vmul.f32 %v1305_v38, %v655_v5 }
 0x10b   : > { %v657_v15 = vadd.f32 %v1305_v38, %v656_v11 }
 0x10d   : > { %v661_v55 = vsel %vm660_vm14, %v1305_v38, %v657_v15 }
 0x10e   : > { %v666_v57 = vsel %vm663_vm15, %v665_v63, %v661_v55 }
 0x10f   : > { %v673_v2 = vrot.slane %v666_v57, 1  ;;  %v676_v54 = vmul.f32 %v1307_v4, %v666_v57  ;;  %v679_v8 = vrot.slane %v666_v57, 2 }
 0x111   : > { %v675_v36 = vmul.f32 %v673_v2, %v555_v62 }
 0x113   : > { %v2065_v37 = vadd.f32 %v676_v54, %v675_v36 }
 0x115   : > { %1308 = vtanh.f32 %v2065_v37 }
 0x11b   : > { %v1309_v1 = vpop.eup %1308 }
 0x11c   : > { %v681_v41 = vmul.f32 %v1309_v1, %v679_v8 }
 0x11e   : > { %701 = vmatmul.f32.vlgmr.msra.gmra.mxu0 %v681_v41  ;;  %682 = vst [vmem:[%s1704_s8] sm:$0x1] %v681_v41  ;;  %721 = vmatmul.f32.vlgmr.msra.gmra.mxu1 %v681_v41 }
 0x11f   : > { %741 = vmatmul.f32.vlgmr.msra.gmra.mxu2 %v681_v41  ;;  %761 = vmatmul.f32.vlgmr.msra.gmra.mxu3 %v681_v41  ;;  %v813_v41 = vld [vmem:[#allocation4 + $0x8] sm:$0xf] }
 0x120   : > { %943 = vmatpush.msra.mxu0 %v1732_v17  ;;  %963 = vmatpush.msra.mxu1 %v1730_v16  ;;  %v2245_v16 = vld [vmem:[#allocation20_spill] sm:$0xff]  ;;  %v2246_v17 = vld [vmem:[#allocation21_spill] sm:$0xff] }
 0x121   : > { %983 = vmatpush.msra.mxu2 %v1714_v6  ;;  %1003 = vmatpush.msra.mxu3 %v1716_v7  ;;  %v2239_v6 = vld [vmem:[#allocation28_spill] sm:$0xff] }
 0x122   : > { %944 = vmatpush.msra.mxu0 %v1742_v21  ;;  %964 = vmatpush.msra.mxu1 %v1740_v20  ;;  %v2240_v7 = vld [vmem:[#allocation24_spill] sm:$0xff]  ;;  %v2249_v20 = vld [vmem:[#allocation22_spill] sm:$0xff]  ;;  %v2250_v21 = vld [vmem:[#allocation23_spill] sm:$0xff] }
 0x123   : > { %984 = vmatpush.msra.mxu2 %v1718_v9  ;;  %1004 = vmatpush.msra.mxu3 %v1720_v10  ;;  %v2241_v9 = vld [vmem:[#allocation18_spill] sm:$0xff]  ;;  %v2242_v10 = vld [vmem:[#allocation19_spill] sm:$0xff] }
 0x124   : > { %945 = vmatpush.msra.mxu0 %v1754_v25  ;;  %965 = vmatpush.msra.mxu1 %v1752_v24  ;;  %v2253_v24 = vld [vmem:[#allocation25_spill] sm:$0xff]  ;;  %v2254_v25 = vld [vmem:[#allocation26_spill] sm:$0xff] }
 0x125   : > { %985 = vmatpush.msra.mxu2 %v1724_v13  ;;  %1005 = vmatpush.msra.mxu3 %v1726_v14  ;;  %v2243_v13 = vld [vmem:[#allocation31_spill] sm:$0xff] }
 0x126   : > { %946 = vmatpush.msra.mxu0 %v1766_v29  ;;  %966 = vmatpush.msra.mxu1 %v1764_v28  ;;  %v2244_v14 = vld [vmem:[#allocation27_spill] sm:$0xff]  ;;  %v2257_v28 = vld [vmem:[#allocation29_spill] sm:$0xff]  ;;  %v2258_v29 = vld [vmem:[#allocation30_spill] sm:$0xff] }
 0x127   : > { %986 = vmatpush.msra.mxu2 %v1734_v18  ;;  %1006 = vmatpush.msra.mxu3 %v1736_v19  ;;  %v2247_v18 = vld [vmem:[#allocation33_spill] sm:$0xff]  ;;  %v2248_v19 = vld [vmem:[#allocation32_spill] sm:$0xff] }
 0x128   : > { %947 = vmatpush.msra.mxu0 %v1782_v35  ;;  %967 = vmatpush.msra.mxu1 %v1774_v32 }
 0x129   : > { %987 = vmatpush.msra.mxu2 %v1746_v22  ;;  %1007 = vmatpush.msra.mxu3 %v1748_v23  ;;  %v2251_v22 = vld [vmem:[#allocation35_spill] sm:$0xff]  ;;  %v2252_v23 = vld [vmem:[#allocation34_spill] sm:$0xff] }
 0x12a   : > { %948 = vmatpush.msra.mxu0 %v1793_v40  ;;  %968 = vmatpush.msra.mxu1 %v1791_v39 }
 0x12b   : > { %988 = vmatpush.msra.mxu2 %v1758_v26  ;;  %1008 = vmatpush.msra.mxu3 %v1760_v27  ;;  %v2255_v26 = vld [vmem:[#allocation37_spill] sm:$0xff]  ;;  %v2256_v27 = vld [vmem:[#allocation36_spill] sm:$0xff] }
 0x12c   : > { %949 = vmatpush.msra.mxu0 %v1806_v45  ;;  %969 = vmatpush.msra.mxu1 %v1804_v44 }
 0x12d   : > { %989 = vmatpush.msra.mxu2 %v1770_v30  ;;  %1009 = vmatpush.msra.mxu3 %v1772_v31 }
 0x12e   : > { %950 = vmatpush.msra.mxu0 %v1818_v49  ;;  %970 = vmatpush.msra.mxu1 %v1816_v48 }
 0x12f   : > { %990 = vmatpush.msra.mxu2 %v1778_v33  ;;  %1010 = vmatpush.msra.mxu3 %v1780_v34 }
 0x130   : > { %951 = vmatpush.msra.mxu0 %v1830_v53  ;;  %971 = vmatpush.msra.mxu1 %v1828_v52 }
 0x131   : > { %991 = vmatpush.msra.mxu2 %v1798_v42  ;;  %1011 = vmatpush.msra.mxu3 %v1800_v43  ;;  %v684_v43 = vld [vmem:[#allocation4 + $0x4] sm:$0xf] }
 0x132   : > { %952 = vmatpush.msra.mxu0 %v1850_v60  ;;  %972 = vmatpush.msra.mxu1 %v1842_v56 }
 0x133   : > { %992 = vmatpush.msra.mxu2 %v1810_v46  ;;  %1012 = vmatpush.msra.mxu3 %v1812_v47 }
 0x134   : > { %953 = vmatpush.msra.mxu0 %v1864_v0  ;;  %973 = vmatpush.msra.mxu1 %v1854_v61 }
 0x135   : > { %993 = vmatpush.msra.mxu2 %v1822_v50  ;;  %1013 = vmatpush.msra.mxu3 %v1824_v51 }
 0x136   : > { %954 = vmatpush.msra.mxu0 %v2239_v6  ;;  %974 = vmatpush.msra.mxu1 %v2240_v7 }
 0x137   : > { %994 = vmatpush.msra.mxu2 %v2241_v9  ;;  %1014 = vmatpush.msra.mxu3 %v2242_v10 }
 0x138   : > { %955 = vmatpush.msra.mxu0 %v2243_v13  ;;  %975 = vmatpush.msra.mxu1 %v2244_v14 }
 0x139   : > { %995 = vmatpush.msra.mxu2 %v2245_v16  ;;  %1015 = vmatpush.msra.mxu3 %v2246_v17 }
 0x13a   : > { %956 = vmatpush.msra.mxu0 %v2247_v18  ;;  %976 = vmatpush.msra.mxu1 %v2248_v19 }
 0x13b   : > { %996 = vmatpush.msra.mxu2 %v2249_v20  ;;  %1016 = vmatpush.msra.mxu3 %v2250_v21 }
 0x13c   : > { %957 = vmatpush.msra.mxu0 %v2251_v22  ;;  %977 = vmatpush.msra.mxu1 %v2252_v23 }
 0x13d   : > { %997 = vmatpush.msra.mxu2 %v2253_v24  ;;  %1017 = vmatpush.msra.mxu3 %v2254_v25 }
 0x13e   : > { %958 = vmatpush.msra.mxu0 %v2255_v26  ;;  %978 = vmatpush.msra.mxu1 %v2256_v27 }
 0x13f   : > { %998 = vmatpush.msra.mxu2 %v2257_v28  ;;  %1018 = vmatpush.msra.mxu3 %v2258_v29 }
 0x19b   : > { %v722_v30 = vpop.f32.mrf.mxu1  ;;  %v702_v39 = vpop.f32.mrf.mxu0 }
 0x19c   : > { %v769_v31 = vrot.slane %v722_v30, 7 }
 0x19e   : > { %v772_v40 = vsel %vm453_vm6, %v702_v39, %v769_v31 }
 0x1a2   : > { %v742_v32 = vpop.f32.mrf.mxu2  ;;  %v762_v33 = vpop.f32.mrf.mxu3 }
 0x1a3   : > { %v770_v34 = vrot.slane %v742_v32, 6  ;;  %v771_v35 = vrot.slane %v762_v33, 5 }
 0x1a5   : > { %v773_v42 = vsel %vm455_vm1, %v770_v34, %v771_v35 }
 0x1a6   : > { %v774_v44 = vsel %vm457_vm11, %v772_v40, %v773_v42 }
 0x1a7   : > { %v776_v45 = vadd.f32 %v774_v44, %v684_v43 }
 0x1a9   : > { %v1209_v46 = vmul.f32 -1.442695, %v776_v45  ;;  %v797_v51 = vrot.slane %v776_v45, 3 }
 0x1ab   : > { %1310 = vpow2.f32 %v1209_v46 }
 0x1b1   : > { %v1311_v47 = vpop.eup %1310 }
 0x1b2   : > { %v780_v48 = vadd.f32 1.0, %v1311_v47  ;;  %v942_v47 = vld [vmem:[#allocation4 + $0xc] sm:$0xf] }
 0x1b4   : > { %1312 = vrcp.f32 %v780_v48  ;;  %v792_v53 = vand.u32 2147483648, %v780_v48  ;;  %v790_v60 = vand.u32 2147483647, %v780_v48  ;;  %vm786_vm2 = vweird.f32 %v780_v48 }
 0x1b5   : > { %1314 = vtanh.f32 %v797_v51 }
 0x1b6   : > { %v793_v0 = vor.u32 1.1754944e-38, %v792_v53  ;;  %vm791_vm4 = vcmp.eq.f32.partialorder %v790_v60, 8.507059e+37 }
 0x1ba   : > { %v1313_v49 = vpop.eup %1312 }
 0x1bb   : > { %v782_v50 = vmul.f32 %v1313_v49, %v780_v48  ;;  %vm787_vm0 = vweird.f32 %v1313_v49  ;;  %v1315_v5 = vpop.eup %1314 }
 0x1bc   : > { %vm788_vm3 = vmor %vm786_vm2, %vm787_vm0 }
 0x1bd   : > { %v783_v52 = vsub.f32 1.0, %v782_v50 }
 0x1bf   : > { %v784_v56 = vmul.f32 %v1313_v49, %v783_v52 }
 0x1c1   : > { %v785_v61 = vadd.f32 %v1313_v49, %v784_v56 }
 0x1c3   : > { %v789_v3 = vsel %vm788_vm3, %v1313_v49, %v785_v61 }
 0x1c4   : > { %v794_v38 = vsel %vm791_vm4, %v793_v0, %v789_v3 }
 0x1c5   : > { %v801_v59 = vrot.slane %v794_v38, 1  ;;  %v804_v11 = vmul.f32 %v1315_v5, %v794_v38  ;;  %v807_v15 = vrot.slane %v794_v38, 2 }
 0x1c7   : > { %v803_v58 = vmul.f32 %v801_v59, %v2065_v37 }
 0x1c9   : > { %v805_v12 = vadd.f32 %v804_v11, %v803_v58 }
 0x1cb   : > { %1316 = vtanh.f32 %v805_v12 }
 0x1d1   : > { %v1317_v63 = vpop.eup %1316 }
 0x1d2   : > { %v809_v55 = vmul.f32 %v1317_v63, %v807_v15 }
 0x1d4   : > { %830 = vmatmul.f32.vlgmr.msrb.gmra.mxu0 %v809_v55  ;;  %1210 = vst [vmem:[%s1704_s8 + $0x1] sm:$0x1] %v809_v55  ;;  %850 = vmatmul.f32.vlgmr.msrb.gmra.mxu1 %v809_v55 }
 0x1d5   : > { %870 = vmatmul.f32.vlgmr.msrb.gmra.mxu2 %v809_v55  ;;  %890 = vmatmul.f32.vlgmr.msrb.gmra.mxu3 %v809_v55 }
 0x251   : > { %v851_v62 = vpop.f32.mrf.mxu1  ;;  %v831_v8 = vpop.f32.mrf.mxu0 }
 0x252   : > { %v898_v57 = vrot.slane %v851_v62, 7 }
 0x254   : > { %v901_v37 = vsel %vm453_vm6, %v831_v8, %v898_v57 }
 0x258   : > { %v871_v2 = vpop.f32.mrf.mxu2  ;;  %v891_v4 = vpop.f32.mrf.mxu3 }
 0x259   : > { %v899_v36 = vrot.slane %v871_v2, 6  ;;  %v900_v54 = vrot.slane %v891_v4, 5 }
 0x25b   : > { %v902_v1 = vsel %vm455_vm1, %v899_v36, %v900_v54 }
 0x25c   : > { %v903_v6 = vsel %vm457_vm11, %v901_v37, %v902_v1 }
 0x25d   : > { %v905_v7 = vadd.f32 %v903_v6, %v813_v41 }
 0x25f   : > { %v1211_v9 = vmul.f32 -1.442695, %v905_v7  ;;  %v926_v17 = vrot.slane %v905_v7, 3 }
 0x261   : > { %1318 = vpow2.f32 %v1211_v9 }
 0x267   : > { %v1319_v10 = vpop.eup %1318 }
 0x268   : > { %v909_v13 = vadd.f32 1.0, %v1319_v10 }
 0x26a   : > { %1320 = vrcp.f32 %v909_v13  ;;  %v921_v19 = vand.u32 2147483648, %v909_v13  ;;  %v919_v21 = vand.u32 2147483647, %v909_v13  ;;  %vm915_vm7 = vweird.f32 %v909_v13 }
 0x26b   : > { %1322 = vtanh.f32 %v926_v17 }
 0x26c   : > { %v922_v23 = vor.u32 1.1754944e-38, %v921_v19  ;;  %vm920_vm9 = vcmp.eq.f32.partialorder %v919_v21, 8.507059e+37 }
 0x270   : > { %v1321_v14 = vpop.eup %1320 }
 0x271   : > { %v911_v16 = vmul.f32 %v1321_v14, %v909_v13  ;;  %vm916_vm5 = vweird.f32 %v1321_v14  ;;  %v1323_v27 = vpop.eup %1322 }
 0x272   : > { %vm917_vm8 = vmor %vm915_vm7, %vm916_vm5 }
 0x273   : > { %v912_v18 = vsub.f32 1.0, %v911_v16 }
 0x275   : > { %v913_v20 = vmul.f32 %v1321_v14, %v912_v18 }
 0x277   : > { %v914_v22 = vadd.f32 %v1321_v14, %v913_v20 }
 0x279   : > { %v918_v24 = vsel %vm917_vm8, %v1321_v14, %v914_v22 }
 0x27a   : > { %v923_v25 = vsel %vm920_vm9, %v922_v23, %v918_v24 }
 0x27b   : > { %v930_v26 = vrot.slane %v923_v25, 1  ;;  %v933_v29 = vmul.f32 %v1323_v27, %v923_v25  ;;  %v936_v31 = vrot.slane %v923_v25, 2 }
 0x27d   : > { %v932_v28 = vmul.f32 %v930_v26, %v805_v12 }
 0x27f   : > { %v934_v30 = vadd.f32 %v933_v29, %v932_v28 }
 0x281   : > { %1324 = vtanh.f32 %v934_v30 }
 0x287   : > { %v1325_v32 = vpop.eup %1324 }
 0x288   : > { %v938_v33 = vmul.f32 %v1325_v32, %v936_v31 }
 0x28a   : > { %959 = vmatmul.f32.vlgmr.msra.gmra.mxu0 %v938_v33  ;;  %1212 = vst [vmem:[%s1704_s8 + $0x2] sm:$0x1] %v938_v33  ;;  %979 = vmatmul.f32.vlgmr.msra.gmra.mxu1 %v938_v33 }
 0x28b   : > { %999 = vmatmul.f32.vlgmr.msra.gmra.mxu2 %v938_v33  ;;  %1019 = vmatmul.f32.vlgmr.msra.gmra.mxu3 %v938_v33 }
 0x307   : > { %v980_v34 = vpop.f32.mrf.mxu1  ;;  %v960_v44 = vpop.f32.mrf.mxu0 }
 0x308   : > { %v1027_v35 = vrot.slane %v980_v34, 7 }
 0x30a   : > { %v1030_v45 = vsel %vm453_vm6, %v960_v44, %v1027_v35 }
 0x30e   : > { %v1000_v39 = vpop.f32.mrf.mxu2  ;;  %v1020_v40 = vpop.f32.mrf.mxu3 }
 0x30f   : > { %v1028_v42 = vrot.slane %v1000_v39, 6  ;;  %v1029_v43 = vrot.slane %v1020_v40, 5 }
 0x311   : > { %v1031_v46 = vsel %vm455_vm1, %v1028_v42, %v1029_v43 }
 0x312   : > { %v1032_v48 = vsel %vm457_vm11, %v1030_v45, %v1031_v46 }
 0x313   : > { %v1034_v49 = vadd.f32 %v1032_v48, %v942_v47 }
 0x315   : > { %v1213_v50 = vmul.f32 -1.442695, %v1034_v49  ;;  %v1055_v60 = vrot.slane %v1034_v49, 3 }
 0x317   : > { %1326 = vpow2.f32 %v1213_v50 }
 0x31d   : > { %v1327_v51 = vpop.eup %1326 }
 0x31e   : > { %v1038_v52 = vadd.f32 1.0, %v1327_v51 }
 0x320   : > { %1328 = vrcp.f32 %v1038_v52  ;;  %v1050_v0 = vand.u32 2147483648, %v1038_v52  ;;  %v1048_v38 = vand.u32 2147483647, %v1038_v52  ;;  %vm1044_vm1 = vweird.f32 %v1038_v52 }
 0x321   : > { %1330 = vtanh.f32 %v1055_v60 }
 0x322   : > { %v1051_v5 = vor.u32 1.1754944e-38, %v1050_v0  ;;  %vm1049_vm11 = vcmp.eq.f32.partialorder %v1048_v38, 8.507059e+37 }
 0x326   : > { %v1329_v53 = vpop.eup %1328 }
 0x327   : > { %v1040_v56 = vmul.f32 %v1329_v53, %v1038_v52  ;;  %vm1045_vm10 = vweird.f32 %v1329_v53  ;;  %v1331_v15 = vpop.eup %1330 }
 0x328   : > { %vm1046_vm6 = vmor %vm1044_vm1, %vm1045_vm10 }
 0x329   : > { %v1041_v61 = vsub.f32 1.0, %v1040_v56 }
 0x32b   : > { %v1042_v3 = vmul.f32 %v1329_v53, %v1041_v61 }
 0x32d   : > { %v1043_v59 = vadd.f32 %v1329_v53, %v1042_v3 }
 0x32f   : > { %v1047_v58 = vsel %vm1046_vm6, %v1329_v53, %v1043_v59 }
 0x330   : > { %v1052_v11 = vsel %vm1049_vm11, %v1051_v5, %v1047_v58 }
 0x331   : > { %v1059_v12 = vrot.slane %v1052_v11, 1  ;;  %v1062_v55 = vmul.f32 %v1331_v15, %v1052_v11  ;;  %v1065_v57 = vrot.slane %v1052_v11, 2 }
 0x333   : > { %v1061_v63 = vmul.f32 %v1059_v12, %v934_v30 }
 0x335   : > { %v1063_v62 = vadd.f32 %v1062_v55, %v1061_v63 }
 0x337   : > { %1332 = vtanh.f32 %v1063_v62  ;;  %1071 = vst [vmem:[#allocation3] sm:$0x1] %v1063_v62 }
 0x33d   : > { %v1333_v2 = vpop.eup %1332 }
 0x33e   : > { %v1067_v4 = vmul.f32 %v1333_v2, %v1065_v57 }
 0x340   : > { %1214 = vst [vmem:[%s1704_s8 + $0x3] sm:$0x1] %v1067_v4 }
 0x341   : > { %1070 = vst [vmem:[#allocation2] sm:$0x1] %v1067_v4 }
 0x342   : > { %1481 = shalt.err (!%p1478_p13)
}
 0x343   : > { %s1537_s15 = smov 16   ;;  %s1538_s8 = smov 1  }
 0x344   : > { %1233 = dma.vmem_to_hbm [thread:$0]  (%p1658_p10), %s1085_s14, 64, %s1087_s20, %s1073_s11, %s1537_s15, %s1537_s15, %s1538_s8  }
 0x345 PF: > { %s1101_s30 = sand.u32 1, %s1516_s21   ;;  %p2259_p0 = scmp.ge.s32.totalorder %s1528_s24, 2 }
 0x346   : > { %s1102_s16 = scalar_lea.sflag [#allocation7], %s1101_s30 }
 0x347   : > { %p1250_p3 = pnand %p2259_p0, %p1609_p6 }
 0x349   : > { %p1251_p5 = pneg %p1250_p3 }
 0x34b   : > { %1511 = dma.done.wait (%p1251_p5), %s1102_s16, 64  }
 0x34c   : > { %1513 = vsyncadd (%p1251_p5), %s1102_s16, 4294967232  ;;  %p21_p7 = scmp.ge.s32.totalorder %s1642_s7, 4   ;;  %s2260_s21 = smov %s1520_s22 }
 0x34d   : > { %s2261_s22 = smov %s1524_s23  ;;  %s2262_s23 = smov %s1654_s12 }
 0x34e   : > { %s2263_s24 = smov %s1642_s7  ;;  %23 = sbr.rel (!%p21_p7) target bundleno = 7 (0x7), region = 114 }
 0x353   :  { %1108 = vsyncpa [#allocation6], 1 }
 0x354   :  { %1110 = vsyncpa [#allocation6 + $0x1], 1 }
 0x355   :  { %1111 = vsyncpa [#allocation9], 1 }
 0x356   :  { %1112 = vsyncpa [#allocation12], 1 }
 0x357   :  { %1113 = vsyncpa [#allocation7], 1 }
 0x358   :  { %1115 = vsyncpa [#allocation7 + $0x1], 1 }

</bundles_post_ra>
